<compile_context>
chip_gen: v7x
topology: tpu7x:2x2x1
jax: 0.10.0
libtpu: 0.0.40
codegen_flags: <defaults>
</compile_context>

<pallas_src>
import functools

import jax
import jax.numpy as jnp
from jax.experimental import pallas as pl
from jax.experimental.pallas import tpu as pltpu


def _round_up(x, m):
    return (x + m - 1) // m * m


def _choose_tk(K):
    """Largest tk in {512, 256, 128} dividing round_up(K, 128) (minimal K padding)."""
    klane = _round_up(K, 128)
    for cand in (512, 256, 128):
        if klane % cand == 0:
            return cand, klane
    return 128, klane  # unreachable: 128 always divides klane


# ---------------------------------------------------------------------------
# Pallas kernel: tiled (cols @ wmat) with f32 accumulator + bias [+ LeakyReLU]
# ---------------------------------------------------------------------------
def _matmul_bias_act_kernel(cols_ref, w_ref, b_ref, o_ref, acc_ref, *,
                            negative_slope, apply_act):
    @pl.when(pl.program_id(2) == 0)
    def _init():
        acc_ref[...] = jnp.zeros_like(acc_ref)

    acc_ref[...] += jnp.dot(cols_ref[...], w_ref[...],
                            preferred_element_type=jnp.float32)

    @pl.when(pl.program_id(2) == pl.num_programs(2) - 1)
    def _finalize():
        acc = acc_ref[...] + b_ref[...]          # (tm, tn) + (1, tn)
        if apply_act:
            acc = jnp.where(acc >= 0, acc, negative_slope * acc)
        o_ref[...] = acc.astype(o_ref.dtype)


# ---------------------------------------------------------------------------
# Pallas kernel for the Cout=1 classifier: GEMV via VPU multiply + lane reduce
# ---------------------------------------------------------------------------
def _gemv_bias_kernel(cols_ref, w_ref, b_ref, o_ref, acc_ref):
    @pl.when(pl.program_id(1) == 0)
    def _init():
        acc_ref[...] = jnp.zeros_like(acc_ref)

    prod = cols_ref[...].astype(jnp.float32) * w_ref[...].astype(jnp.float32)
    acc_ref[...] += jnp.sum(prod, axis=1, keepdims=True)      # (tm, 1)

    @pl.when(pl.program_id(1) == pl.num_programs(1) - 1)
    def _finalize():
        o_ref[...] = (acc_ref[...] + b_ref[...]).astype(o_ref.dtype)


# ---------------------------------------------------------------------------
# im2col patch extraction (layout plumbing in the wrapper, done in bf16)
# ---------------------------------------------------------------------------
def _im2col(x_nhwc, k, stride, pad):
    N, H, W, C = x_nhwc.shape
    xp = jnp.pad(x_nhwc, ((0, 0), (pad, pad), (pad, pad), (0, 0)))
    Ho = (H + 2 * pad - k) // stride + 1
    Wo = (W + 2 * pad - k) // stride + 1
    patches = []
    for i in range(k):
        for j in range(k):
            patches.append(xp[:, i:i + stride * Ho:stride, j:j + stride * Wo:stride, :])
    # (N, Ho, Wo, k*k, C): tap-major / channel-minor, matches weight flattening below.
    p = jnp.stack(patches, axis=3)
    return p.reshape(N * Ho * Wo, k * k * C), Ho, Wo


# ---------------------------------------------------------------------------
# Conv2d (+ optional LeakyReLU) via bf16 im2col + tiled/pipelined Pallas matmul
# ---------------------------------------------------------------------------
def conv2d_pallas(x_nhwc, w_oihw, bias, *, stride, pad, apply_act,
                  slope=0.2, out_dtype=jnp.float32):
    Cout, Cin, KH, KW = w_oihw.shape
    N = x_nhwc.shape[0]

    cols, Ho, Wo = _im2col(x_nhwc.astype(jnp.bfloat16), KH, stride, pad)   # (M, K) bf16
    # (Cout,Cin,KH,KW) -> (KH,KW,Cin,Cout) -> (K, Cout), matching im2col ordering.
    wmat = jnp.transpose(w_oihw, (2, 3, 1, 0)).reshape(KH * KW * Cin, Cout)
    wmat = wmat.astype(jnp.bfloat16)

    M, K = cols.shape

    # --- tile geometry: (8,128)-aligned, lane-dense output, divisor-aware K tiling ---
    tk, Kp = _choose_tk(K)
    tn = 256 if Cout >= 256 else 128
    Np = _round_up(Cout, tn)
    nj = Np // tn
    tm = min(512, _round_up(M, 16))          # multiple of 16 for bf16 sublane packing
    Mp = _round_up(M, tm)
    nm = Mp // tm
    # Megacore (v7x): make sure there are >= 2 independent (i, j) tiles when possible.
    if nm * nj < 2 and tm > 16:
        tm = max(16, _round_up(tm // 2, 16))
        Mp = _round_up(M, tm)
        nm = Mp // tm
    nk = Kp // tk

    cols_p = jnp.pad(cols, ((0, Mp - M), (0, Kp - K)))
    wmat_p = jnp.pad(wmat, ((0, Kp - K), (0, Np - Cout)))
    bias_p = jnp.pad(bias.astype(jnp.float32), (0, Np - Cout)).reshape(1, Np)

    kernel = functools.partial(_matmul_bias_act_kernel,
                               negative_slope=slope, apply_act=apply_act)

    out_bytes = jnp.dtype(out_dtype).itemsize
    # VMEM budget: double-buffered bf16 input tiles + double-buffered output tile
    # + f32 accumulator + bias; cap at 32 MiB so v7x (64 MiB physical) keeps headroom.
    vmem_bytes = (2 * (tm * tk + tk * tn) * 2      # cols / weight tiles (bf16, x2 buf)
                  + 2 * tm * tn * out_bytes        # output tile (x2 buf)
                  + tm * tn * 4                    # accumulator scratch
                  + 2 * tn * 4)                    # bias tile
    vmem_limit = int(min(max(2 * vmem_bytes, 8 * 1024 * 1024), 32 * 1024 * 1024))

    cost = pl.CostEstimate(
        flops=2 * Mp * Kp * Np,
        transcendentals=0,
        bytes_accessed=Mp * Kp * 2 + Kp * Np * 2 + Mp * Np * out_bytes + Np * 4,
    )

    grid_spec = pltpu.PrefetchScalarGridSpec(
        num_scalar_prefetch=0,
        grid=(nm, nj, nk),
        in_specs=[
            pl.BlockSpec((tm, tk), lambda i, j, k: (i, k)),   # cols tile
            pl.BlockSpec((tk, tn), lambda i, j, k: (k, j)),   # weight tile
            pl.BlockSpec((1, tn), lambda i, j, k: (0, j)),    # bias tile
        ],
        out_specs=pl.BlockSpec((tm, tn), lambda i, j, k: (i, j)),
        scratch_shapes=[pltpu.VMEM((tm, tn), jnp.float32)],
    )

    out_p = pl.pallas_call(
        kernel,
        out_shape=jax.ShapeDtypeStruct((Mp, Np), out_dtype),
        grid_spec=grid_spec,
        compiler_params=pltpu.CompilerParams(
            dimension_semantics=("parallel", "parallel", "arbitrary"),
            vmem_limit_bytes=vmem_limit,
        ),
        cost_estimate=cost,
    )(cols_p, wmat_p, bias_p)

    out = out_p[:M, :Cout]
    return out.reshape(N, Ho, Wo, Cout)


# ---------------------------------------------------------------------------
# Classifier (Cout=1) via a dedicated Pallas GEMV kernel (no 128x Cout padding)
# ---------------------------------------------------------------------------
def conv2d_cout1_pallas(x_nhwc, w_oihw, bias, *, stride, pad):
    Cout, Cin, KH, KW = w_oihw.shape
    assert Cout == 1
    N = x_nhwc.shape[0]

    cols, Ho, Wo = _im2col(x_nhwc.astype(jnp.bfloat16), KH, stride, pad)   # (M, K) bf16
    wvec = jnp.transpose(w_oihw, (2, 3, 1, 0)).reshape(1, KH * KW * Cin)
    wvec = wvec.astype(jnp.bfloat16)

    M, K = cols.shape
    tk, Kp = _choose_tk(K)
    tm = min(512, _round_up(M, 16))
    Mp = _round_up(M, tm)
    nm, nk = Mp // tm, Kp // tk

    cols_p = jnp.pad(cols, ((0, Mp - M), (0, Kp - K)))
    w_p = jnp.pad(wvec, ((0, 0), (0, Kp - K)))
    b_p = bias.astype(jnp.float32).reshape(1, 1)

    cost = pl.CostEstimate(
        flops=2 * Mp * Kp,
        transcendentals=0,
        bytes_accessed=Mp * Kp * 2 + Kp * 2 + Mp * 4,
    )

    grid_spec = pltpu.PrefetchScalarGridSpec(
        num_scalar_prefetch=0,
        grid=(nm, nk),
        in_specs=[
            pl.BlockSpec((tm, tk), lambda i, k: (i, k)),   # cols tile
            pl.BlockSpec((1, tk), lambda i, k: (0, k)),    # weight row
            pl.BlockSpec((1, 1), lambda i, k: (0, 0)),     # scalar bias
        ],
        out_specs=pl.BlockSpec((tm, 1), lambda i, k: (i, 0)),
        scratch_shapes=[pltpu.VMEM((tm, 1), jnp.float32)],
    )

    out_p = pl.pallas_call(
        _gemv_bias_kernel,
        out_shape=jax.ShapeDtypeStruct((Mp, 1), jnp.float32),
        grid_spec=grid_spec,
        compiler_params=pltpu.CompilerParams(
            dimension_semantics=("parallel", "arbitrary"),
            vmem_limit_bytes=16 * 1024 * 1024,
        ),
        cost_estimate=cost,
    )(cols_p, w_p, b_p)

    return out_p[:M].reshape(N, Ho, Wo, 1)


# ---------------------------------------------------------------------------
# Discriminator: parameter construction + forward pass
# ---------------------------------------------------------------------------
def init_discriminator_params(key, num_classes, dim):
    specs = [
        # (Cin, Cout, k)
        (num_classes, dim,     5),   # conv1
        (dim,         dim * 2, 3),   # conv2
        (dim * 2,     dim * 4, 3),   # conv3
        (dim * 4,     dim * 8, 3),   # conv4
        (dim * 8,     1,       3),   # classifier
    ]
    params = []
    for cin, cout, k in specs:
        key, kw_, kb_ = jax.random.split(key, 3)
        w = 0.02 * jax.random.normal(kw_, (cout, cin, k, k), dtype=jnp.float32)
        b = 0.02 * jax.random.normal(kb_, (cout,), dtype=jnp.float32)
        params.append((w, b))
    return params


@jax.jit
def discriminator_forward(params, x_nchw):
    # NCHW -> NHWC for the kernel path.
    x = jnp.transpose(x_nchw, (0, 2, 3, 1))
    (w1, b1), (w2, b2), (w3, b3), (w4, b4), (wc, bc) = params
    # Hidden layers emit bf16 (next layer consumes bf16 anyway); classifier emits f32.
    x = conv2d_pallas(x, w1, b1, stride=2, pad=1, apply_act=True, out_dtype=jnp.bfloat16)
    x = conv2d_pallas(x, w2, b2, stride=1, pad=1, apply_act=True, out_dtype=jnp.bfloat16)
    x = conv2d_pallas(x, w3, b3, stride=1, pad=1, apply_act=True, out_dtype=jnp.bfloat16)
    x = conv2d_pallas(x, w4, b4, stride=1, pad=1, apply_act=True, out_dtype=jnp.bfloat16)
    x = conv2d_cout1_pallas(x, wc, bc, stride=1, pad=1)
    # NHWC -> NCHW to match PyTorch output convention.
    return jnp.transpose(x, (0, 3, 1, 2))


# ---------------------------------------------------------------------------
# Pure-JAX reference (lax conv with the same bf16-operand / f32-accumulate recipe)
# ---------------------------------------------------------------------------
def _ref_conv(x_nchw, w, b, stride, pad, act):
    y = jax.lax.conv_general_dilated(
        x_nchw.astype(jnp.bfloat16), w.astype(jnp.bfloat16),
        window_strides=(stride, stride),
        padding=[(pad, pad), (pad, pad)],
        dimension_numbers=("NCHW", "OIHW", "NCHW"),
        preferred_element_type=jnp.float32)
    y = y + b.reshape(1, -1, 1, 1)
    if act:
        y = jnp.where(y >= 0, y, 0.2 * y)
    return y


@jax.jit
def discriminator_reference(params, x_nchw):
    (w1, b1), (w2, b2), (w3, b3), (w4, b4), (wc, bc) = params
    x = _ref_conv(x_nchw, w1, b1, 2, 1, True)
    x = _ref_conv(x, w2, b2, 1, 1, True)
    x = _ref_conv(x, w3, b3, 1, 1, True)
    x = _ref_conv(x, w4, b4, 1, 1, True)
    x = _ref_conv(x, wc, bc, 1, 1, False)
    return x


if __name__ == "__main__":
    NUM_CLASSES = 4   # in_channels of conv1
    DIM = 8           # small stand-in for dim=64
    N, H, W = 2, 16, 16

    key = jax.random.PRNGKey(0)
    kx, kp = jax.random.split(key)
    x = jax.random.normal(kx, (N, NUM_CLASSES, H, W), dtype=jnp.float32)
    params = init_discriminator_params(kp, NUM_CLASSES, DIM)

    out = discriminator_forward(params, x)
    out = jax.block_until_ready(out)

    # shape: conv1 (k=5,s=2,p=1): 16 -> 7; remaining convs preserve spatial; final channels = 1
    assert out.shape == (N, 1, 7, 7), out.shape

    ref = jax.block_until_ready(discriminator_reference(params, x))
    assert jnp.allclose(out, ref, atol=1e-3, rtol=1e-2), float(jnp.max(jnp.abs(out - ref)))

    print("KERNEL_OK")
</pallas_src>

<mosaic_0001>
module attributes {stable_mosaic.version = 11 : i64} {
  func.func @_matmul_bias_act_kernel(%arg0: i32, %arg1: i32, %arg2: i32, %arg3: memref<64x128xbf16, #tpu.memory_space<vmem>>, %arg4: memref<128x128xbf16, #tpu.memory_space<vmem>>, %arg5: memref<1x128xf32, #tpu.memory_space<vmem>>, %arg6: memref<64x128xbf16, #tpu.memory_space<vmem>>, %arg7: memref<64x128xf32, #tpu.memory_space<vmem>>) attributes {dimension_semantics = [#tpu.dimension_semantics<parallel>, #tpu.dimension_semantics<parallel>, #tpu.dimension_semantics<arbitrary>], iteration_bounds = array<i64: 2, 1, 1>, scalar_prefetch = 0 : i64, scratch_operands = 1 : i64, tpu.core_type = #tpu.core_type<tc>, window_params = [{transform_indices = @transform_0, window_bounds = array<i64: 64, 128>}, {transform_indices = @transform_1, window_bounds = array<i64: 128, 128>}, {transform_indices = @transform_2, window_bounds = array<i64: 1, 128>}, {transform_indices = @transform_3, window_bounds = array<i64: 64, 128>}]} {
    %c0_i32 = arith.constant 0 : i32
    %0 = arith.cmpi eq, %arg2, %c0_i32 : i32
    %1 = arith.extui %0 : i1 to i32
    %c0_i32_0 = arith.constant 0 : i32
    %2 = arith.cmpi ne, %1, %c0_i32_0 : i32
    scf.if %2 {
      %cst_10 = arith.constant 0.000000e+00 : f32
      %12 = vector.broadcast %cst_10 : f32 to vector<64x128xf32>
      %c0_11 = arith.constant 0 : index
      %c0_12 = arith.constant 0 : index
      %13 = vector.load %arg7[%c0_11, %c0_12] : memref<64x128xf32, #tpu.memory_space<vmem>>, vector<64x128xf32>
      tpu.vector_store %arg7[%c0_11, %c0_12], %12 {strides = array<i32>} : memref<64x128xf32, #tpu.memory_space<vmem>>, vector<64x128xf32>,
    } else {
    }
    %c0 = arith.constant 0 : index
    %c0_1 = arith.constant 0 : index
    %3 = vector.load %arg7[%c0, %c0_1] : memref<64x128xf32, #tpu.memory_space<vmem>>, vector<64x128xf32>
    %c0_2 = arith.constant 0 : index
    %c0_3 = arith.constant 0 : index
    %4 = vector.load %arg3[%c0_2, %c0_3] : memref<64x128xbf16, #tpu.memory_space<vmem>>, vector<64x128xbf16>
    %c0_4 = arith.constant 0 : index
    %c0_5 = arith.constant 0 : index
    %5 = vector.load %arg4[%c0_4, %c0_5] : memref<128x128xbf16, #tpu.memory_space<vmem>>, vector<128x128xbf16>
    %cst = arith.constant dense<0.000000e+00> : vector<64x128xf32>
    %6 = tpu.matmul %4, %5, %cst {dimension_numbers = #tpu.dot_dimension_numbers<[1], [0], [0], [1], [0, 0, 1, 1], [], []>} : vector<64x128xbf16>, vector<128x128xbf16>, vector<64x128xf32> -> vector<64x128xf32>
    %7 = arith.addf %3, %6 : vector<64x128xf32>
    %c0_6 = arith.constant 0 : index
    %c0_7 = arith.constant 0 : index
    %8 = vector.load %arg7[%c0_6, %c0_7] : memref<64x128xf32, #tpu.memory_space<vmem>>, vector<64x128xf32>
    tpu.vector_store %arg7[%c0_6, %c0_7], %7 {strides = array<i32>} : memref<64x128xf32, #tpu.memory_space<vmem>>, vector<64x128xf32>,
    %c0_i32_8 = arith.constant 0 : i32
    %9 = arith.cmpi eq, %arg2, %c0_i32_8 : i32
    %10 = arith.extui %9 : i1 to i32
    %c0_i32_9 = arith.constant 0 : i32
    %11 = arith.cmpi ne, %10, %c0_i32_9 : i32
    scf.if %11 {
      %c0_10 = arith.constant 0 : index
      %c0_11 = arith.constant 0 : index
      %12 = vector.load %arg7[%c0_10, %c0_11] : memref<64x128xf32, #tpu.memory_space<vmem>>, vector<64x128xf32>
      %c0_12 = arith.constant 0 : index
      %c0_13 = arith.constant 0 : index
      %13 = vector.load %arg5[%c0_12, %c0_13] : memref<1x128xf32, #tpu.memory_space<vmem>>, vector<1x128xf32>
      %14 = vector.broadcast %13 : vector<1x128xf32> to vector<64x128xf32>
      %15 = arith.addf %12, %14 : vector<64x128xf32>
      %cst_14 = arith.constant 0.000000e+00 : f32
      %16 = vector.broadcast %cst_14 : f32 to vector<64x128xf32>
      %17 = arith.cmpf oge, %15, %16 : vector<64x128xf32>
      %cst_15 = arith.constant 2.000000e-01 : f32
      %18 = vector.broadcast %cst_15 : f32 to vector<64x128xf32>
      %19 = arith.mulf %18, %15 : vector<64x128xf32>
      %20 = arith.select %17, %15, %19 : vector<64x128xi1>, vector<64x128xf32>
      %21 = arith.truncf %20 : vector<64x128xf32> to vector<64x128xbf16>
      %c0_16 = arith.constant 0 : index
      %c0_17 = arith.constant 0 : index
      %22 = vector.load %arg6[%c0_16, %c0_17] : memref<64x128xbf16, #tpu.memory_space<vmem>>, vector<64x128xbf16>
      tpu.vector_store %arg6[%c0_16, %c0_17], %21 {strides = array<i32>} : memref<64x128xbf16, #tpu.memory_space<vmem>>, vector<64x128xbf16>,
    } else {
    }
    return
  }
  func.func @transform_0(%arg0: i32, %arg1: i32, %arg2: i32) -> (i32, i32) {
    %c0_i32 = arith.constant 0 : i32
    return %arg0, %arg2 : i32, i32
  }
  func.func @transform_1(%arg0: i32, %arg1: i32, %arg2: i32) -> (i32, i32) {
    %c0_i32 = arith.constant 0 : i32
    return %arg2, %arg1 : i32, i32
  }
  func.func @transform_2(%arg0: i32, %arg1: i32, %arg2: i32) -> (i32, i32) {
    %c0_i32 = arith.constant 0 : i32
    %c0_i32_0 = arith.constant 0 : i32
    return %c0_i32, %arg1 : i32, i32
  }
  func.func @transform_3(%arg0: i32, %arg1: i32, %arg2: i32) -> (i32, i32) {
    %c0_i32 = arith.constant 0 : i32
    return %arg0, %arg1 : i32, i32
  }
}

module attributes {stable_mosaic.version = 11 : i64} {
  func.func @_matmul_bias_act_kernel(%arg0: i32, %arg1: i32, %arg2: i32, %arg3: memref<64x256xbf16, #tpu.memory_space<vmem>>, %arg4: memref<256x128xbf16, #tpu.memory_space<vmem>>, %arg5: memref<1x128xf32, #tpu.memory_space<vmem>>, %arg6: memref<64x128xbf16, #tpu.memory_space<vmem>>, %arg7: memref<64x128xf32, #tpu.memory_space<vmem>>) attributes {dimension_semantics = [#tpu.dimension_semantics<parallel>, #tpu.dimension_semantics<parallel>, #tpu.dimension_semantics<arbitrary>], iteration_bounds = array<i64: 2, 1, 1>, scalar_prefetch = 0 : i64, scratch_operands = 1 : i64, tpu.core_type = #tpu.core_type<tc>, window_params = [{transform_indices = @transform_0, window_bounds = array<i64: 64, 256>}, {transform_indices = @transform_1, window_bounds = array<i64: 256, 128>}, {transform_indices = @transform_2, window_bounds = array<i64: 1, 128>}, {transform_indices = @transform_3, window_bounds = array<i64: 64, 128>}]} {
    %c0_i32 = arith.constant 0 : i32
    %0 = arith.cmpi eq, %arg2, %c0_i32 : i32
    %1 = arith.extui %0 : i1 to i32
    %c0_i32_0 = arith.constant 0 : i32
    %2 = arith.cmpi ne, %1, %c0_i32_0 : i32
    scf.if %2 {
      %cst_10 = arith.constant 0.000000e+00 : f32
      %12 = vector.broadcast %cst_10 : f32 to vector<64x128xf32>
      %c0_11 = arith.constant 0 : index
      %c0_12 = arith.constant 0 : index
      %13 = vector.load %arg7[%c0_11, %c0_12] : memref<64x128xf32, #tpu.memory_space<vmem>>, vector<64x128xf32>
      tpu.vector_store %arg7[%c0_11, %c0_12], %12 {strides = array<i32>} : memref<64x128xf32, #tpu.memory_space<vmem>>, vector<64x128xf32>,
    } else {
    }
    %c0 = arith.constant 0 : index
    %c0_1 = arith.constant 0 : index
    %3 = vector.load %arg7[%c0, %c0_1] : memref<64x128xf32, #tpu.memory_space<vmem>>, vector<64x128xf32>
    %c0_2 = arith.constant 0 : index
    %c0_3 = arith.constant 0 : index
    %4 = vector.load %arg3[%c0_2, %c0_3] : memref<64x256xbf16, #tpu.memory_space<vmem>>, vector<64x256xbf16>
    %c0_4 = arith.constant 0 : index
    %c0_5 = arith.constant 0 : index
    %5 = vector.load %arg4[%c0_4, %c0_5] : memref<256x128xbf16, #tpu.memory_space<vmem>>, vector<256x128xbf16>
    %cst = arith.constant dense<0.000000e+00> : vector<64x128xf32>
    %6 = tpu.matmul %4, %5, %cst {dimension_numbers = #tpu.dot_dimension_numbers<[1], [0], [0], [1], [0, 0, 1, 1], [], []>} : vector<64x256xbf16>, vector<256x128xbf16>, vector<64x128xf32> -> vector<64x128xf32>
    %7 = arith.addf %3, %6 : vector<64x128xf32>
    %c0_6 = arith.constant 0 : index
    %c0_7 = arith.constant 0 : index
    %8 = vector.load %arg7[%c0_6, %c0_7] : memref<64x128xf32, #tpu.memory_space<vmem>>, vector<64x128xf32>
    tpu.vector_store %arg7[%c0_6, %c0_7], %7 {strides = array<i32>} : memref<64x128xf32, #tpu.memory_space<vmem>>, vector<64x128xf32>,
    %c0_i32_8 = arith.constant 0 : i32
    %9 = arith.cmpi eq, %arg2, %c0_i32_8 : i32
    %10 = arith.extui %9 : i1 to i32
    %c0_i32_9 = arith.constant 0 : i32
    %11 = arith.cmpi ne, %10, %c0_i32_9 : i32
    scf.if %11 {
      %c0_10 = arith.constant 0 : index
      %c0_11 = arith.constant 0 : index
      %12 = vector.load %arg7[%c0_10, %c0_11] : memref<64x128xf32, #tpu.memory_space<vmem>>, vector<64x128xf32>
      %c0_12 = arith.constant 0 : index
      %c0_13 = arith.constant 0 : index
      %13 = vector.load %arg5[%c0_12, %c0_13] : memref<1x128xf32, #tpu.memory_space<vmem>>, vector<1x128xf32>
      %14 = vector.broadcast %13 : vector<1x128xf32> to vector<64x128xf32>
      %15 = arith.addf %12, %14 : vector<64x128xf32>
      %cst_14 = arith.constant 0.000000e+00 : f32
      %16 = vector.broadcast %cst_14 : f32 to vector<64x128xf32>
      %17 = arith.cmpf oge, %15, %16 : vector<64x128xf32>
      %cst_15 = arith.constant 2.000000e-01 : f32
      %18 = vector.broadcast %cst_15 : f32 to vector<64x128xf32>
      %19 = arith.mulf %18, %15 : vector<64x128xf32>
      %20 = arith.select %17, %15, %19 : vector<64x128xi1>, vector<64x128xf32>
      %21 = arith.truncf %20 : vector<64x128xf32> to vector<64x128xbf16>
      %c0_16 = arith.constant 0 : index
      %c0_17 = arith.constant 0 : index
      %22 = vector.load %arg6[%c0_16, %c0_17] : memref<64x128xbf16, #tpu.memory_space<vmem>>, vector<64x128xbf16>
      tpu.vector_store %arg6[%c0_16, %c0_17], %21 {strides = array<i32>} : memref<64x128xbf16, #tpu.memory_space<vmem>>, vector<64x128xbf16>,
    } else {
    }
    return
  }
  func.func @transform_0(%arg0: i32, %arg1: i32, %arg2: i32) -> (i32, i32) {
    %c0_i32 = arith.constant 0 : i32
    return %arg0, %arg2 : i32, i32
  }
  func.func @transform_1(%arg0: i32, %arg1: i32, %arg2: i32) -> (i32, i32) {
    %c0_i32 = arith.constant 0 : i32
    return %arg2, %arg1 : i32, i32
  }
  func.func @transform_2(%arg0: i32, %arg1: i32, %arg2: i32) -> (i32, i32) {
    %c0_i32 = arith.constant 0 : i32
    %c0_i32_0 = arith.constant 0 : i32
    return %c0_i32, %arg1 : i32, i32
  }
  func.func @transform_3(%arg0: i32, %arg1: i32, %arg2: i32) -> (i32, i32) {
    %c0_i32 = arith.constant 0 : i32
    return %arg0, %arg1 : i32, i32
  }
}

module attributes {stable_mosaic.version = 11 : i64} {
  func.func @_matmul_bias_act_kernel(%arg0: i32, %arg1: i32, %arg2: i32, %arg3: memref<64x128xbf16, #tpu.memory_space<vmem>>, %arg4: memref<128x128xbf16, #tpu.memory_space<vmem>>, %arg5: memref<1x128xf32, #tpu.memory_space<vmem>>, %arg6: memref<64x128xbf16, #tpu.memory_space<vmem>>, %arg7: memref<64x128xf32, #tpu.memory_space<vmem>>) attributes {dimension_semantics = [#tpu.dimension_semantics<parallel>, #tpu.dimension_semantics<parallel>, #tpu.dimension_semantics<arbitrary>], iteration_bounds = array<i64: 2, 1, 3>, scalar_prefetch = 0 : i64, scratch_operands = 1 : i64, tpu.core_type = #tpu.core_type<tc>, window_params = [{transform_indices = @transform_0, window_bounds = array<i64: 64, 128>}, {transform_indices = @transform_1, window_bounds = array<i64: 128, 128>}, {transform_indices = @transform_2, window_bounds = array<i64: 1, 128>}, {transform_indices = @transform_3, window_bounds = array<i64: 64, 128>}]} {
    %c0_i32 = arith.constant 0 : i32
    %0 = arith.cmpi eq, %arg2, %c0_i32 : i32
    %1 = arith.extui %0 : i1 to i32
    %c0_i32_0 = arith.constant 0 : i32
    %2 = arith.cmpi ne, %1, %c0_i32_0 : i32
    scf.if %2 {
      %cst_9 = arith.constant 0.000000e+00 : f32
      %12 = vector.broadcast %cst_9 : f32 to vector<64x128xf32>
      %c0_10 = arith.constant 0 : index
      %c0_11 = arith.constant 0 : index
      %13 = vector.load %arg7[%c0_10, %c0_11] : memref<64x128xf32, #tpu.memory_space<vmem>>, vector<64x128xf32>
      tpu.vector_store %arg7[%c0_10, %c0_11], %12 {strides = array<i32>} : memref<64x128xf32, #tpu.memory_space<vmem>>, vector<64x128xf32>,
    } else {
    }
    %c0 = arith.constant 0 : index
    %c0_1 = arith.constant 0 : index
    %3 = vector.load %arg7[%c0, %c0_1] : memref<64x128xf32, #tpu.memory_space<vmem>>, vector<64x128xf32>
    %c0_2 = arith.constant 0 : index
    %c0_3 = arith.constant 0 : index
    %4 = vector.load %arg3[%c0_2, %c0_3] : memref<64x128xbf16, #tpu.memory_space<vmem>>, vector<64x128xbf16>
    %c0_4 = arith.constant 0 : index
    %c0_5 = arith.constant 0 : index
    %5 = vector.load %arg4[%c0_4, %c0_5] : memref<128x128xbf16, #tpu.memory_space<vmem>>, vector<128x128xbf16>
    %cst = arith.constant dense<0.000000e+00> : vector<64x128xf32>
    %6 = tpu.matmul %4, %5, %cst {dimension_numbers = #tpu.dot_dimension_numbers<[1], [0], [0], [1], [0, 0, 1, 1], [], []>} : vector<64x128xbf16>, vector<128x128xbf16>, vector<64x128xf32> -> vector<64x128xf32>
    %7 = arith.addf %3, %6 : vector<64x128xf32>
    %c0_6 = arith.constant 0 : index
    %c0_7 = arith.constant 0 : index
    %8 = vector.load %arg7[%c0_6, %c0_7] : memref<64x128xf32, #tpu.memory_space<vmem>>, vector<64x128xf32>
    tpu.vector_store %arg7[%c0_6, %c0_7], %7 {strides = array<i32>} : memref<64x128xf32, #tpu.memory_space<vmem>>, vector<64x128xf32>,
    %c2_i32 = arith.constant 2 : i32
    %9 = arith.cmpi eq, %arg2, %c2_i32 : i32
    %10 = arith.extui %9 : i1 to i32
    %c0_i32_8 = arith.constant 0 : i32
    %11 = arith.cmpi ne, %10, %c0_i32_8 : i32
    scf.if %11 {
      %c0_9 = arith.constant 0 : index
      %c0_10 = arith.constant 0 : index
      %12 = vector.load %arg7[%c0_9, %c0_10] : memref<64x128xf32, #tpu.memory_space<vmem>>, vector<64x128xf32>
      %c0_11 = arith.constant 0 : index
      %c0_12 = arith.constant 0 : index
      %13 = vector.load %arg5[%c0_11, %c0_12] : memref<1x128xf32, #tpu.memory_space<vmem>>, vector<1x128xf32>
      %14 = vector.broadcast %13 : vector<1x128xf32> to vector<64x128xf32>
      %15 = arith.addf %12, %14 : vector<64x128xf32>
      %cst_13 = arith.constant 0.000000e+00 : f32
      %16 = vector.broadcast %cst_13 : f32 to vector<64x128xf32>
      %17 = arith.cmpf oge, %15, %16 : vector<64x128xf32>
      %cst_14 = arith.constant 2.000000e-01 : f32
      %18 = vector.broadcast %cst_14 : f32 to vector<64x128xf32>
      %19 = arith.mulf %18, %15 : vector<64x128xf32>
      %20 = arith.select %17, %15, %19 : vector<64x128xi1>, vector<64x128xf32>
      %21 = arith.truncf %20 : vector<64x128xf32> to vector<64x128xbf16>
      %c0_15 = arith.constant 0 : index
      %c0_16 = arith.constant 0 : index
      %22 = vector.load %arg6[%c0_15, %c0_16] : memref<64x128xbf16, #tpu.memory_space<vmem>>, vector<64x128xbf16>
      tpu.vector_store %arg6[%c0_15, %c0_16], %21 {strides = array<i32>} : memref<64x128xbf16, #tpu.memory_space<vmem>>, vector<64x128xbf16>,
    } else {
    }
    return
  }
  func.func @transform_0(%arg0: i32, %arg1: i32, %arg2: i32) -> (i32, i32) {
    %c0_i32 = arith.constant 0 : i32
    return %arg0, %arg2 : i32, i32
  }
  func.func @transform_1(%arg0: i32, %arg1: i32, %arg2: i32) -> (i32, i32) {
    %c0_i32 = arith.constant 0 : i32
    return %arg2, %arg1 : i32, i32
  }
  func.func @transform_2(%arg0: i32, %arg1: i32, %arg2: i32) -> (i32, i32) {
    %c0_i32 = arith.constant 0 : i32
    %c0_i32_0 = arith.constant 0 : i32
    return %c0_i32, %arg1 : i32, i32
  }
  func.func @transform_3(%arg0: i32, %arg1: i32, %arg2: i32) -> (i32, i32) {
    %c0_i32 = arith.constant 0 : i32
    return %arg0, %arg1 : i32, i32
  }
}

module attributes {stable_mosaic.version = 11 : i64} {
  func.func @_gemv_bias_kernel(%arg0: i32, %arg1: i32, %arg2: memref<112x128xbf16, #tpu.memory_space<vmem>>, %arg3: memref<1x128xbf16, #tpu.memory_space<vmem>>, %arg4: memref<1x1xf32, #tpu.memory_space<vmem>>, %arg5: memref<112x1xf32, #tpu.memory_space<vmem>>, %arg6: memref<112x1xf32, #tpu.memory_space<vmem>>) attributes {dimension_semantics = [#tpu.dimension_semantics<parallel>, #tpu.dimension_semantics<arbitrary>], iteration_bounds = array<i64: 1, 5>, scalar_prefetch = 0 : i64, scratch_operands = 1 : i64, tpu.core_type = #tpu.core_type<tc>, window_params = [{transform_indices = @transform_0, window_bounds = array<i64: 112, 128>}, {transform_indices = @transform_1, window_bounds = array<i64: 1, 128>}, {pipeline_mode = #tpu.pipeline_mode<synchronous>, transform_indices = @transform_2, window_bounds = array<i64: 1, 1>}, {transform_indices = @transform_3, window_bounds = array<i64: 112, 1>}]} {
    %c0_i32 = arith.constant 0 : i32
    %0 = arith.cmpi eq, %arg1, %c0_i32 : i32
    %1 = arith.extui %0 : i1 to i32
    %c0_i32_0 = arith.constant 0 : i32
    %2 = arith.cmpi ne, %1, %c0_i32_0 : i32
    scf.if %2 {
      %cst_9 = arith.constant 0.000000e+00 : f32
      %17 = vector.broadcast %cst_9 : f32 to vector<112x1xf32>
      %c0_10 = arith.constant 0 : index
      %c0_11 = arith.constant 0 : index
      %18 = vector.load %arg6[%c0_10, %c0_11] : memref<112x1xf32, #tpu.memory_space<vmem>>, vector<112x1xf32>
      tpu.vector_store %arg6[%c0_10, %c0_11], %17 {strides = array<i32>} : memref<112x1xf32, #tpu.memory_space<vmem>>, vector<112x1xf32>,
    } else {
    }
    %c0 = arith.constant 0 : index
    %c0_1 = arith.constant 0 : index
    %3 = vector.load %arg2[%c0, %c0_1] : memref<112x128xbf16, #tpu.memory_space<vmem>>, vector<112x128xbf16>
    %4 = arith.extf %3 : vector<112x128xbf16> to vector<112x128xf32>
    %c0_2 = arith.constant 0 : index
    %c0_3 = arith.constant 0 : index
    %5 = vector.load %arg3[%c0_2, %c0_3] : memref<1x128xbf16, #tpu.memory_space<vmem>>, vector<1x128xbf16>
    %6 = arith.extf %5 : vector<1x128xbf16> to vector<1x128xf32>
    %7 = vector.broadcast %6 : vector<1x128xf32> to vector<112x128xf32>
    %8 = arith.mulf %4, %7 : vector<112x128xf32>
    %c0_4 = arith.constant 0 : index
    %c0_5 = arith.constant 0 : index
    %9 = vector.load %arg6[%c0_4, %c0_5] : memref<112x1xf32, #tpu.memory_space<vmem>>, vector<112x1xf32>
    %cst = arith.constant dense<0.000000e+00> : vector<112xf32>
    %10 = vector.multi_reduction <add>, %8, %cst [1] : vector<112x128xf32> to vector<112xf32>
    %11 = vector.shape_cast %10 : vector<112xf32> to vector<112x1xf32>
    %12 = arith.addf %9, %11 : vector<112x1xf32>
    %c0_6 = arith.constant 0 : index
    %c0_7 = arith.constant 0 : index
    %13 = vector.load %arg6[%c0_6, %c0_7] : memref<112x1xf32, #tpu.memory_space<vmem>>, vector<112x1xf32>
    tpu.vector_store %arg6[%c0_6, %c0_7], %12 {strides = array<i32>} : memref<112x1xf32, #tpu.memory_space<vmem>>, vector<112x1xf32>,
    %c4_i32 = arith.constant 4 : i32
    %14 = arith.cmpi eq, %arg1, %c4_i32 : i32
    %15 = arith.extui %14 : i1 to i32
    %c0_i32_8 = arith.constant 0 : i32
    %16 = arith.cmpi ne, %15, %c0_i32_8 : i32
    scf.if %16 {
      %c0_9 = arith.constant 0 : index
      %c0_10 = arith.constant 0 : index
      %17 = vector.load %arg6[%c0_9, %c0_10] : memref<112x1xf32, #tpu.memory_space<vmem>>, vector<112x1xf32>
      %c0_11 = arith.constant 0 : index
      %c0_12 = arith.constant 0 : index
      %18 = vector.load %arg4[%c0_11, %c0_12] : memref<1x1xf32, #tpu.memory_space<vmem>>, vector<1x1xf32>
      %19 = vector.broadcast %18 : vector<1x1xf32> to vector<112x1xf32>
      %20 = arith.addf %17, %19 : vector<112x1xf32>
      %c0_13 = arith.constant 0 : index
      %c0_14 = arith.constant 0 : index
      %21 = vector.load %arg5[%c0_13, %c0_14] : memref<112x1xf32, #tpu.memory_space<vmem>>, vector<112x1xf32>
      tpu.vector_store %arg5[%c0_13, %c0_14], %20 {strides = array<i32>} : memref<112x1xf32, #tpu.memory_space<vmem>>, vector<112x1xf32>,
    } else {
    }
    return
  }
  func.func @transform_0(%arg0: i32, %arg1: i32) -> (i32, i32) {
    %c0_i32 = arith.constant 0 : i32
    return %arg0, %arg1 : i32, i32
  }
  func.func @transform_1(%arg0: i32, %arg1: i32) -> (i32, i32) {
    %c0_i32 = arith.constant 0 : i32
    %c0_i32_0 = arith.constant 0 : i32
    return %c0_i32, %arg1 : i32, i32
  }
  func.func @transform_2(%arg0: i32, %arg1: i32) -> (i32, i32) {
    %c0_i32 = arith.constant 0 : i32
    %c0_i32_0 = arith.constant 0 : i32
    %c0_i32_1 = arith.constant 0 : i32
    return %c0_i32, %c0_i32_0 : i32, i32
  }
  func.func @transform_3(%arg0: i32, %arg1: i32) -> (i32, i32) {
    %c0_i32 = arith.constant 0 : i32
    %c0_i32_0 = arith.constant 0 : i32
    return %arg0, %c0_i32 : i32, i32
  }
}

</mosaic_0001>

<bundles_post_ra>
// kernel: discriminator_forward.5
= control target key start
LH: loop header
LB: loop body
LE: loop exit
PB: predicated region body
PF: predicated region fallthrough
CT: control target
= control target key end

     0   :  { %s855_s12 = smov 0   ;;  %s857_s13 = smov 0   ;;  %s930_s0 = inlined_call_operand.vmem [shape: bf16[128,128], index: 0, kind: input, shape index: {}]   ;;  %s931_s1 = inlined_call_operand.vmem [shape: bf16[128,128], index: 1, kind: input, shape index: {}]   ;;  %s932_s2 = inlined_call_operand.vmem [shape: f32[1,128], index: 2, kind: input, shape index: {}]   ;;  %s933_s3 = inlined_call_operand.vmem [shape: bf16[128,128], index: 3, kind: output, shape index: {}]  }
   0x1   :  { %s859_s14 = smov 0  }
   0x2 LB: > { %s32_s15 = sadd.s32 1, %s829_s13  ;;  %p664_p0 = scmp.ge.s32.totalorder %s833_s14, 1  ;;  %s833_s14 = sphi %s859_s14, %s13_s14   ;;  %s829_s13 = sphi %s857_s13, %s935_s13   ;;  %s825_s12 = sphi %s855_s12, %s934_s12  }
   0x3   : > { %p34_p1 = scmp.ge.s32.totalorder %s32_s15, 2  ;;  %p188_p2 = scmp.lt.s32.totalorder %s833_s14, 3 }
   0x5   : > { %s937_s15 = smov (%p34_p1, %s32_s15), 0  ;;  %p189_p3 = pnand %p664_p0, %p188_p2 }
   0x6   : > { %v799_v0 = vld [vmem:[%s931_s1] sm:$0xff] (!%p189_p3)   ;;  %s665_s18 = sshll.u32 (!%p189_p3), %s825_s12, 3  ;;  %v800_v1 = vld [vmem:[%s931_s1 + $0x8] sm:$0xff] (!%p189_p3)   ;;  %v801_v2 = vld [vmem:[%s931_s1 + $0x10] sm:$0xff] (!%p189_p3)  }
   0x7   : > { %192 = sbr.rel (%p189_p3) target bundleno = 264 (0x108), region = 32  ;;  %p230_p4 = scmp.lt.s32.totalorder (!%p189_p3), %s665_s18, 15  ;;  %735 = vmatprep.subr.bf16.mxu0 (!%p189_p3), %v799_v0  ;;  %759 = vmatprep.subr.bf16.mxu1 (!%p189_p3), %v799_v0  ;;  %v802_v3 = vld [vmem:[%s931_s1 + $0x18] sm:$0xff] (!%p189_p3)   ;;  %v803_v6 = vld [vmem:[%s931_s1 + $0x20] sm:$0xff] (!%p189_p3)   ;;  %v804_v7 = vld [vmem:[%s931_s1 + $0x28] sm:$0xff] (!%p189_p3)  }
   0x8   : > { %736 = vmatpush3.bf16.msra.mxu0 (!%p189_p3), %v799_v0  ;;  %767 = vmatpush3.bf16.msra.mxu1 (!%p189_p3), %v799_v0  ;;  %v805_v8 = vld [vmem:[%s931_s1 + $0x30] sm:$0xff] (!%p189_p3)   ;;  %v806_v9 = vld [vmem:[%s931_s1 + $0x38] sm:$0xff] (!%p189_p3)   ;;  %v681_v12 = vld [vmem:[%s932_s2] ss:$0 sm:$0xff] (!%p189_p3) }
   0x9   : > { %737 = vmatprep.subr.bf16.mxu0 (!%p189_p3), %v800_v1  ;;  %760 = vmatprep.subr.bf16.mxu1 (!%p189_p3), %v800_v1 }
   0xc   : > { %738 = vmatpush3.bf16.msra.mxu0 (!%p189_p3), %v800_v1  ;;  %768 = vmatpush3.bf16.msra.mxu1 (!%p189_p3), %v800_v1 }
   0xd   : > { %739 = vmatprep.subr.bf16.mxu0 (!%p189_p3), %v801_v2  ;;  %761 = vmatprep.subr.bf16.mxu1 (!%p189_p3), %v801_v2 }
   0xe   : > { %s939_s18 = smov (!%p230_p4, %s665_s18), 15 }
   0xf   : > { %s666_s23 = sshll.u32 %s939_s18, 2 }
  0x10   : > { %s890_s26 = scalar_lea.vmem %s930_s0, %s666_s23  ;;  %740 = vmatpush3.bf16.msra.mxu0 %v801_v2  ;;  %769 = vmatpush3.bf16.msra.mxu1 %v801_v2  ;;  %s257_s17 = scalar_lea.vmem %s933_s3, %s666_s23 }
  0x11   : > { %v807_v4 = vld [vmem:[%s890_s26] sm:$0xff]   ;;  %v808_v5 = vld [vmem:[%s890_s26 + $0x10] sm:$0xff]   ;;  %741 = vmatprep.subr.bf16.mxu0 %v802_v3  ;;  %762 = vmatprep.subr.bf16.mxu1 %v802_v3  ;;  %v809_v10 = vld [vmem:[%s890_s26 + $0x8] sm:$0xff]  }
  0x12   : > { %751 = vmatprep.mubr.bf16.mxu0 %v807_v4  ;;  %755 = vmatprep.mubr.bf16.mxu1 %v808_v5  ;;  %v810_v11 = vld [vmem:[%s890_s26 + $0x18] sm:$0xff]  }
  0x14   : > { %742 = vmatpush3.bf16.msra.mxu0 %v802_v3  ;;  %770 = vmatpush3.bf16.msra.mxu1 %v802_v3 }
  0x15   : > { %743 = vmatprep.subr.bf16.mxu0 %v803_v6  ;;  %763 = vmatprep.subr.bf16.mxu1 %v803_v6 }
  0x18   : > { %744 = vmatpush3.bf16.msra.mxu0 %v803_v6  ;;  %771 = vmatpush3.bf16.msra.mxu1 %v803_v6 }
  0x19   : > { %745 = vmatprep.subr.bf16.mxu0 %v804_v7  ;;  %764 = vmatprep.subr.bf16.mxu1 %v804_v7 }
  0x1c   : > { %746 = vmatpush3.bf16.msra.mxu0 %v804_v7  ;;  %772 = vmatpush3.bf16.msra.mxu1 %v804_v7 }
  0x1d   : > { %747 = vmatprep.subr.bf16.mxu0 %v805_v8  ;;  %765 = vmatprep.subr.bf16.mxu1 %v805_v8 }
  0x20   : > { %748 = vmatpush3.bf16.msra.mxu0 %v805_v8  ;;  %773 = vmatpush3.bf16.msra.mxu1 %v805_v8 }
  0x21   : > { %749 = vmatprep.subr.bf16.mxu0 %v806_v9  ;;  %766 = vmatprep.subr.bf16.mxu1 %v806_v9 }
  0x24   : > { %750 = vmatpush3.bf16.msra.mxu0 %v806_v9  ;;  %774 = vmatpush3.bf16.msra.mxu1 %v806_v9 }
  0x27   : > { %752 = vmatmul.mubr.bf16.vlgmr.msra.gmra.mrb[0].mxu0 %v809_v10  ;;  %756 = vmatmul.mubr.bf16.vlgmr.msra.gmra.mrb[0].mxu1 %v810_v11 }
  0xfa   : > { %v753_v13 = vpop.f32.mrb[0].mxu0  ;;  %v757_v14 = vpop.f32.mrb[0].mxu1 }
  0xfb   : > { %v477_v15 = vadd.f32 %v753_v13, %v681_v12  ;;  %v481_v16 = vadd.f32 %v757_v14, %v681_v12  ;;  %v410_v17 = vpop.f32.mrb[1].mxu0  ;;  %v426_v18 = vpop.f32.mrb[1].mxu1 }
  0xfc   : > { %v475_v19 = vadd.f32 %v681_v12, %v410_v17  ;;  %v479_v20 = vadd.f32 %v681_v12, %v426_v18  ;;  %v754_v21 = vpop.f32.mrb[2].mxu0  ;;  %v758_v22 = vpop.f32.mrb[2].mxu1 }
  0xfd   : > { %vm485_vm0 = vcmp.ge.f32.partialorder %v477_v15, 0.0  ;;  %v493_v23 = vmul.f32 0.2, %v477_v15  ;;  %vm489_vm1 = vcmp.ge.f32.partialorder %v481_v16, 0.0  ;;  %v497_v24 = vmul.f32 0.2, %v481_v16 }
  0xfe   : > { %vm483_vm2 = vcmp.ge.f32.partialorder %v475_v19, 0.0  ;;  %v491_v25 = vmul.f32 0.2, %v475_v19  ;;  %vm487_vm3 = vcmp.ge.f32.partialorder %v479_v20, 0.0  ;;  %v495_v26 = vmul.f32 0.2, %v479_v20 }
  0xff   : > { %v478_v27 = vadd.f32 %v754_v21, %v681_v12  ;;  %v482_v28 = vadd.f32 %v758_v22, %v681_v12  ;;  %v413_v29 = vpop.f32.mrb[3].mxu0  ;;  %v429_v30 = vpop.f32.mrb[3].mxu1  ;;  %v501_v31 = vsel %vm485_vm0, %v477_v15, %v493_v23  ;;  %v505_v32 = vsel %vm489_vm1, %v481_v16, %v497_v24 }
 0x100   : > { %v476_v33 = vadd.f32 %v681_v12, %v413_v29  ;;  %v480_v34 = vadd.f32 %v681_v12, %v429_v30  ;;  %v499_v39 = vsel %vm483_vm2, %v475_v19, %v491_v25  ;;  %v503_v40 = vsel %vm487_vm3, %v479_v20, %v495_v26 }
 0x101   : > { %vm486_vm4 = vcmp.ge.f32.partialorder %v478_v27, 0.0  ;;  %v494_v35 = vmul.f32 0.2, %v478_v27  ;;  %vm490_vm5 = vcmp.ge.f32.partialorder %v482_v28, 0.0  ;;  %v498_v36 = vmul.f32 0.2, %v482_v28 }
 0x102   : > { %vm484_vm6 = vcmp.ge.f32.partialorder %v476_v33, 0.0  ;;  %v492_v37 = vmul.f32 0.2, %v476_v33  ;;  %vm488_vm7 = vcmp.ge.f32.partialorder %v480_v34, 0.0  ;;  %v496_v38 = vmul.f32 0.2, %v480_v34 }
 0x103   : > { %v502_v41 = vsel %vm486_vm4, %v478_v27, %v494_v35  ;;  %v506_v42 = vsel %vm490_vm5, %v482_v28, %v498_v36 }
 0x104   : > { %v708_v43 = vpack.c.bf16 %v502_v41, %v501_v31  ;;  %v718_v44 = vpack.c.bf16 %v506_v42, %v505_v32  ;;  %v500_v45 = vsel %vm484_vm6, %v476_v33, %v492_v37  ;;  %v504_v46 = vsel %vm488_vm7, %v480_v34, %v496_v38 }
 0x105   : > { %v703_v47 = vpack.c.bf16 %v500_v45, %v499_v39  ;;  %v713_v48 = vpack.c.bf16 %v504_v46, %v503_v40 }
 0x106   : > { %720 = vst [vmem:[%s257_s17 + $0x8] sm:$0xff] %v708_v43   ;;  %722 = vst [vmem:[%s257_s17 + $0x18] sm:$0xff] %v718_v44  }
 0x107   : > { %704 = vst [vmem:[%s257_s17] sm:$0xff] %v703_v47   ;;  %721 = vst [vmem:[%s257_s17 + $0x10] sm:$0xff] %v713_v48  }
 0x108 PF: > { %s13_s14 = sadd.s32 1, %s833_s14   ;;  %s934_s12 = smov %s829_s13 }
 0x109   : > { %p10_p5 = scmp.ge.s32.totalorder %s13_s14, 4   ;;  %s935_s13 = smov %s937_s15 }
 0x10b   :  { %12 = sbr.rel (!%p10_p5) target bundleno = 2 (0x2), region = 76 }

// kernel: discriminator_forward.7
= control target key start
LH: loop header
LB: loop body
LE: loop exit
PB: predicated region body
PF: predicated region fallthrough
CT: control target
= control target key end

     0   :  { %s980_s12 = smov 0   ;;  %s982_s13 = smov 0   ;;  %s1084_s0 = inlined_call_operand.vmem [shape: bf16[128,256], index: 0, kind: input, shape index: {}]   ;;  %s1085_s1 = inlined_call_operand.vmem [shape: bf16[256,128], index: 1, kind: input, shape index: {}]   ;;  %s1086_s2 = inlined_call_operand.vmem [shape: f32[1,128], index: 2, kind: input, shape index: {}]   ;;  %s1087_s3 = inlined_call_operand.vmem [shape: bf16[128,128], index: 3, kind: output, shape index: {}]  }
   0x1   :  { %s984_s14 = smov 0  }
   0x2 LB: > { %s32_s15 = sadd.s32 1, %s954_s13  ;;  %p755_p0 = scmp.ge.s32.totalorder %s958_s14, 1  ;;  %s958_s14 = sphi %s984_s14, %s13_s14   ;;  %s954_s13 = sphi %s982_s13, %s1089_s13   ;;  %s950_s12 = sphi %s980_s12, %s1088_s12  }
   0x3   : > { %p34_p1 = scmp.ge.s32.totalorder %s32_s15, 2  ;;  %p191_p2 = scmp.lt.s32.totalorder %s958_s14, 3 }
   0x5   : > { %s1091_s15 = smov (%p34_p1, %s32_s15), 0  ;;  %p192_p3 = pnand %p755_p0, %p191_p2 }
   0x6   : > { %v908_v0 = vld [vmem:[%s1085_s1 + $0x40] sm:$0xff] (!%p192_p3)   ;;  %s756_s18 = sshll.u32 (!%p192_p3), %s950_s12, 3  ;;  %v910_v2 = vld [vmem:[%s1085_s1 + $0x48] sm:$0xff] (!%p192_p3)   ;;  %v912_v4 = vld [vmem:[%s1085_s1 + $0x50] sm:$0xff] (!%p192_p3)  }
   0x7   : > { %195 = sbr.rel (%p192_p3) target bundleno = 273 (0x111), region = 32  ;;  %v909_v1 = vld [vmem:[%s1085_s1] sm:$0xff] (!%p192_p3)   ;;  %828 = vmatprep.subr.bf16.mxu0 (!%p192_p3), %v908_v0  ;;  %868 = vmatprep.subr.bf16.mxu1 (!%p192_p3), %v908_v0  ;;  %v911_v3 = vld [vmem:[%s1085_s1 + $0x8] sm:$0xff] (!%p192_p3)   ;;  %p236_p4 = scmp.lt.s32.totalorder (!%p192_p3), %s756_s18, 15  ;;  %v913_v5 = vld [vmem:[%s1085_s1 + $0x10] sm:$0xff] (!%p192_p3)  }
   0x8   : > { %829 = vmatpush3.bf16.msra.mxu0 (!%p192_p3), %v909_v1  ;;  %876 = vmatpush3.bf16.msra.mxu1 (!%p192_p3), %v909_v1  ;;  %v914_v6 = vld [vmem:[%s1085_s1 + $0x58] sm:$0xff] (!%p192_p3)   ;;  %v916_v8 = vld [vmem:[%s1085_s1 + $0x60] sm:$0xff] (!%p192_p3)   ;;  %v918_v10 = vld [vmem:[%s1085_s1 + $0x68] sm:$0xff] (!%p192_p3)  }
   0x9   : > { %830 = vmatprep.subr.bf16.mxu0 (!%p192_p3), %v910_v2  ;;  %869 = vmatprep.subr.bf16.mxu1 (!%p192_p3), %v910_v2  ;;  %v915_v7 = vld [vmem:[%s1085_s1 + $0x18] sm:$0xff] (!%p192_p3)   ;;  %v917_v9 = vld [vmem:[%s1085_s1 + $0x20] sm:$0xff] (!%p192_p3)   ;;  %v919_v13 = vld [vmem:[%s1085_s1 + $0x28] sm:$0xff] (!%p192_p3)  }
   0xa   : > { %v920_v14 = vld [vmem:[%s1085_s1 + $0x70] sm:$0xff] (!%p192_p3)   ;;  %v922_v16 = vld [vmem:[%s1085_s1 + $0x78] sm:$0xff] (!%p192_p3)   ;;  %v785_v27 = vld [vmem:[%s1086_s2] ss:$0 sm:$0xff] (!%p192_p3) }
   0xb   : > { %v921_v15 = vld [vmem:[%s1085_s1 + $0x30] sm:$0xff] (!%p192_p3)   ;;  %v923_v17 = vld [vmem:[%s1085_s1 + $0x38] sm:$0xff] (!%p192_p3)  }
   0xc   : > { %831 = vmatpush3.bf16.msra.mxu0 (!%p192_p3), %v911_v3  ;;  %877 = vmatpush3.bf16.msra.mxu1 (!%p192_p3), %v911_v3 }
   0xd   : > { %832 = vmatprep.subr.bf16.mxu0 (!%p192_p3), %v912_v4  ;;  %870 = vmatprep.subr.bf16.mxu1 (!%p192_p3), %v912_v4 }
   0xe   : > { %s1093_s18 = smov (!%p236_p4, %s756_s18), 15 }
   0xf   : > { %s796_s6 = sshll.u32 %s1093_s18, 3  ;;  %s760_s5 = sshll.u32 %s1093_s18, 2 }
  0x10   : > { %833 = vmatpush3.bf16.msra.mxu0 %v913_v5  ;;  %878 = vmatpush3.bf16.msra.mxu1 %v913_v5  ;;  %s1031_s11 = scalar_lea.vmem %s1084_s0, %s796_s6  ;;  %s1069_s8 = scalar_lea.vmem %s1087_s3, %s760_s5 }
  0x11   : > { %834 = vmatprep.subr.bf16.mxu0 %v914_v6  ;;  %871 = vmatprep.subr.bf16.mxu1 %v914_v6  ;;  %v926_v11 = vld [vmem:[%s1031_s11 + $0x4] ss:$8 sps:$4 sm:$0xff]   ;;  %v924_v18 = vld [vmem:[%s1031_s11] ss:$8 sps:$4 sm:$0xff]   ;;  %v930_v20 = vld [vmem:[%s1031_s11 + $0x14] ss:$8 sps:$4 sm:$0xff]  }
  0x12   : > { %v929_v12 = vld [vmem:[%s1031_s11 + $0x24] ss:$8 sps:$4 sm:$0xff]   ;;  %496 = vmatprep.mubr.bf16.mxu0 %v926_v11  ;;  %v927_v19 = vld [vmem:[%s1031_s11 + $0x20] ss:$8 sps:$4 sm:$0xff]   ;;  %v932_v21 = vld [vmem:[%s1031_s11 + $0x34] ss:$8 sps:$4 sm:$0xff]  }
  0x13   : > { %512 = vmatprep.mubr.bf16.mxu1 %v929_v12  ;;  %v934_v22 = vld [vmem:[%s1031_s11 + $0x10] ss:$8 sps:$4 sm:$0xff]  }
  0x14   : > { %835 = vmatpush3.bf16.msra.mxu0 %v915_v7  ;;  %879 = vmatpush3.bf16.msra.mxu1 %v915_v7  ;;  %v935_v23 = vld [vmem:[%s1031_s11 + $0x30] ss:$8 sps:$4 sm:$0xff]  }
  0x15   : > { %836 = vmatprep.subr.bf16.mxu0 %v916_v8  ;;  %872 = vmatprep.subr.bf16.mxu1 %v916_v8 }
  0x18   : > { %837 = vmatpush3.bf16.msra.mxu0 %v917_v9  ;;  %880 = vmatpush3.bf16.msra.mxu1 %v917_v9 }
  0x19   : > { %838 = vmatprep.subr.bf16.mxu0 %v918_v10  ;;  %873 = vmatprep.subr.bf16.mxu1 %v918_v10 }
  0x1c   : > { %839 = vmatpush3.bf16.msra.mxu0 %v919_v13  ;;  %881 = vmatpush3.bf16.msra.mxu1 %v919_v13 }
  0x1d   : > { %840 = vmatprep.subr.bf16.mxu0 %v920_v14  ;;  %874 = vmatprep.subr.bf16.mxu1 %v920_v14 }
  0x20   : > { %841 = vmatpush3.bf16.msra.mxu0 %v921_v15  ;;  %882 = vmatpush3.bf16.msra.mxu1 %v921_v15 }
  0x21   : > { %842 = vmatprep.subr.bf16.mxu0 %v922_v16  ;;  %875 = vmatprep.subr.bf16.mxu1 %v922_v16 }
  0x24   : > { %843 = vmatpush3.bf16.msra.mxu0 %v923_v17  ;;  %883 = vmatpush3.bf16.msra.mxu1 %v923_v17 }
  0x27   : > { %497 = vmatmul.mubr.bf16.vlgmr.msra.gmra.mrb[0].mxu0 %v924_v18  ;;  %513 = vmatmul.mubr.bf16.vlgmr.msra.gmra.mrb[0].mxu1 %v927_v19 }
  0x28   : > { %504 = vmatprep.mubr.bf16.mxu0 %v930_v20  ;;  %520 = vmatprep.mubr.bf16.mxu1 %v932_v21 }
  0x2f   : > { %505 = vmatmul.mubr.bf16.gmra.mrb[4].mxu0 %v934_v22  ;;  %521 = vmatmul.mubr.bf16.gmra.mrb[4].mxu1 %v935_v23 }
  0xfa   : > { %v844_v24 = vpop.f32.mrb[0].mxu0  ;;  %v856_v25 = vpop.f32.mrb[0].mxu1 }
  0xfb   : > { %v845_v26 = vpop.f32.mrb[1].mxu0  ;;  %v857_v28 = vpop.f32.mrb[1].mxu1 }
  0xfc   : > { %v846_v29 = vadd.f32 %v845_v26, %v844_v24  ;;  %v858_v30 = vadd.f32 %v857_v28, %v856_v25  ;;  %v847_v31 = vpop.f32.mrb[2].mxu0  ;;  %v859_v32 = vpop.f32.mrb[2].mxu1 }
  0xfd   : > { %v848_v33 = vpop.f32.mrb[3].mxu0  ;;  %v860_v34 = vpop.f32.mrb[3].mxu1 }
  0xfe   : > { %v563_v35 = vadd.f32 %v846_v29, %v785_v27  ;;  %v567_v36 = vadd.f32 %v858_v30, %v785_v27  ;;  %v849_v37 = vadd.f32 %v848_v33, %v847_v31  ;;  %v861_v38 = vadd.f32 %v860_v34, %v859_v32 }
 0x100   : > { %v579_v39 = vmul.f32 0.2, %v563_v35  ;;  %v583_v40 = vmul.f32 0.2, %v567_v36  ;;  %vm571_vm0 = vcmp.ge.f32.partialorder %v563_v35, 0.0  ;;  %vm575_vm1 = vcmp.ge.f32.partialorder %v567_v36, 0.0 }
 0x101   : > { %v564_v41 = vadd.f32 %v849_v37, %v785_v27  ;;  %v568_v42 = vadd.f32 %v861_v38, %v785_v27 }
 0x102   : > { %v850_v43 = vpop.f32.mrb[4].mxu0  ;;  %v862_v44 = vpop.f32.mrb[4].mxu1  ;;  %v587_v47 = vsel %vm571_vm0, %v563_v35, %v579_v39  ;;  %v591_v48 = vsel %vm575_vm1, %v567_v36, %v583_v40 }
 0x103   : > { %vm572_vm2 = vcmp.ge.f32.partialorder %v564_v41, 0.0  ;;  %v580_v45 = vmul.f32 0.2, %v564_v41  ;;  %vm576_vm3 = vcmp.ge.f32.partialorder %v568_v42, 0.0  ;;  %v584_v46 = vmul.f32 0.2, %v568_v42 }
 0x104   : > { %v851_v49 = vpop.f32.mrb[5].mxu0  ;;  %v863_v50 = vpop.f32.mrb[5].mxu1 }
 0x105   : > { %v588_v51 = vsel %vm572_vm2, %v564_v41, %v580_v45  ;;  %v592_v52 = vsel %vm576_vm3, %v568_v42, %v584_v46  ;;  %v852_v53 = vadd.f32 %v851_v49, %v850_v43  ;;  %v864_v54 = vadd.f32 %v863_v50, %v862_v44  ;;  %v853_v55 = vpop.f32.mrb[6].mxu0  ;;  %v865_v56 = vpop.f32.mrb[6].mxu1 }
 0x106   : > { %v808_v57 = vpack.c.bf16 %v588_v51, %v587_v47  ;;  %v818_v58 = vpack.c.bf16 %v592_v52, %v591_v48  ;;  %v854_v59 = vpop.f32.mrb[7].mxu0  ;;  %v866_v60 = vpop.f32.mrb[7].mxu1 }
 0x107   : > { %v565_v61 = vadd.f32 %v852_v53, %v785_v27  ;;  %v569_v62 = vadd.f32 %v864_v54, %v785_v27  ;;  %v855_v63 = vadd.f32 %v854_v59, %v853_v55  ;;  %v867_v0 = vadd.f32 %v866_v60, %v865_v56 }
 0x108   : > { %809 = vst [vmem:[%s1069_s8] sm:$0xff] %v808_v57   ;;  %826 = vst [vmem:[%s1069_s8 + $0x10] sm:$0xff] %v818_v58  }
 0x109   : > { %v581_v1 = vmul.f32 0.2, %v565_v61  ;;  %v585_v2 = vmul.f32 0.2, %v569_v62  ;;  %v566_v3 = vadd.f32 %v855_v63, %v785_v27  ;;  %v570_v4 = vadd.f32 %v867_v0, %v785_v27 }
 0x10a   : > { %vm573_vm4 = vcmp.ge.f32.partialorder %v565_v61, 0.0  ;;  %vm577_vm5 = vcmp.ge.f32.partialorder %v569_v62, 0.0 }
 0x10b   : > { %vm574_vm6 = vcmp.ge.f32.partialorder %v566_v3, 0.0  ;;  %v582_v5 = vmul.f32 0.2, %v566_v3  ;;  %vm578_vm7 = vcmp.ge.f32.partialorder %v570_v4, 0.0  ;;  %v586_v6 = vmul.f32 0.2, %v570_v4 }
 0x10c   : > { %v589_v7 = vsel %vm573_vm4, %v565_v61, %v581_v1  ;;  %v593_v8 = vsel %vm577_vm5, %v569_v62, %v585_v2 }
 0x10d   : > { %v590_v9 = vsel %vm574_vm6, %v566_v3, %v582_v5  ;;  %v594_v10 = vsel %vm578_vm7, %v570_v4, %v586_v6 }
 0x10e   : > { %v813_v11 = vpack.c.bf16 %v590_v9, %v589_v7  ;;  %v823_v12 = vpack.c.bf16 %v594_v10, %v593_v8 }
 0x110   : > { %825 = vst [vmem:[%s1069_s8 + $0x8] sm:$0xff] %v813_v11   ;;  %827 = vst [vmem:[%s1069_s8 + $0x18] sm:$0xff] %v823_v12  }
 0x111 PF: > { %s13_s14 = sadd.s32 1, %s958_s14   ;;  %s1088_s12 = smov %s954_s13 }
 0x112   : > { %p10_p5 = scmp.ge.s32.totalorder %s13_s14, 4   ;;  %s1089_s13 = smov %s1091_s15 }
 0x114   :  { %12 = sbr.rel (!%p10_p5) target bundleno = 2 (0x2), region = 76 }

// kernel: discriminator_forward.8
= control target key start
LH: loop header
LB: loop body
LE: loop exit
PB: predicated region body
PF: predicated region fallthrough
CT: control target
= control target key end

     0   :  { %s996_s12 = smov 0   ;;  %s998_s13 = smov 0   ;;  %s1115_s0 = inlined_call_operand.vmem [shape: bf16[128,384], index: 0, kind: input, shape index: {}]   ;;  %s1116_s1 = inlined_call_operand.vmem [shape: bf16[384,128], index: 1, kind: input, shape index: {}]   ;;  %s1117_s2 = inlined_call_operand.vmem [shape: f32[1,128], index: 2, kind: input, shape index: {}]   ;;  %s1118_s3 = inlined_call_operand.vmem [shape: bf16[128,128], index: 3, kind: output, shape index: {}]  }
   0x1   :  { %s1000_s14 = smov 0   ;;  %s1002_s15 = smov 0  }
   0x2   :  { %s1004_s16 = smov 0   ;;  %s1006_s17 = smov 0  }
   0x3   :  { %s1008_s18 = smov 0  }
   0x4 LB: > { %s25_s19 = sadd.s32 1, %s965_s16  ;;  %s32_s20 = sadd.s32 1, %s969_s17  ;;  %s973_s18 = sphi %s1008_s18, %s13_s18   ;;  %s969_s17 = sphi %s1006_s17, %s1124_s17   ;;  %s965_s16 = sphi %s1004_s16, %s1123_s16   ;;  %s961_s15 = sphi %s1002_s15, %s1122_s15   ;;  %s957_s14 = sphi %s1000_s14, %s1121_s14   ;;  %s953_s13 = sphi %s998_s13, %s1120_s13   ;;  %s949_s12 = sphi %s996_s12, %s1119_s12  }
   0x5   : > { %p26_p0 = scmp.ge.s32.totalorder %s25_s19, 3  ;;  %p48_p1 = scmp.ne.s32.totalorder %s953_s13, %s949_s12 }
   0x6   : > { %p49_p2 = scmp.eq.s32.totalorder %s973_s18, 0  ;;  %s41_s24 = sadd.s32 1, %s953_s13 }
   0x7   : > { %s1126_s19 = smov (%p26_p0, %s25_s19), 0  ;;  %s1128_s20 = smov (!%p26_p0, %s32_s20), %s969_s17 }
   0x8   : > { %p50_p3 = por %p49_p2, %p48_p1  ;;  %p34_p4 = scmp.ge.s32.totalorder %s1128_s20, 2 }
   0x9   : > { %s37_s21 = ssub.s32 %s965_s16, %s1126_s19  ;;  %p730_p6 = scmp.ge.s32.totalorder %s973_s18, 6 }
   0xa   : > { %s1130_s20 = smov (%p34_p4, %s1128_s20), 0 }
   0xb   : > { %s36_s22 = ssub.s32 %s969_s17, %s1130_s20  ;;  %162 = sbr.rel (%p730_p6) target bundleno = 30 (0x1e), region = 20 }
   0xc   : > { %s38_s23 = sor.u32 %s37_s21, %s36_s22 }
   0xd   : > { %p39_p5 = scmp.eq.s32.totalorder %s38_s23, 0 }
   0xf   : > { %s1047_s25 = scalar_select %p39_p5, %s953_s13, %s41_s24  }
  0x12   : > { %165 = sbr.rel (!%p50_p3) target bundleno = 30 (0x1e), region = 24  ;;  %s167_s26 = sand.u32 (%p50_p3), 1, %s953_s13  }
  0x13   : > { %s849_s27 = smul.u32 (%p50_p3), 24, %s969_s17  ;;  %s731_s28 = sshll.u32 (%p50_p3), %s167_s26, 5 }
  0x14   : > { %s169_s7 = scalar_lea.vmem (%p50_p3), [#allocation3], %s731_s28 }
  0x15   : > { %s172_s29 = sadd.s32 (%p50_p3), %s965_s16, %s849_s27 }
  0x16   : > { %s734_s30 = sshll.u32 (%p50_p3), %s172_s29, 2 }
  0x17   : > { %s174_s6 = scalar_lea.vmem (%p50_p3), %s1115_s0, %s734_s30 }
  0x18   : > { %v190_v0 = vld [vmem:[%s174_s6] sm:$0xf] (%p50_p3)  ;;  %v192_v1 = vld [vmem:[%s174_s6 + $0xc] sm:$0xf] (%p50_p3)  ;;  %v194_v2 = vld [vmem:[%s174_s6 + $0x18] sm:$0xf] (%p50_p3) }
  0x19   : > { %191 = vst [vmem:[%s169_s7] sm:$0xf] %v190_v0  ;;  %193 = vst [vmem:[%s169_s7 + $0x4] sm:$0xf] %v192_v1  ;;  %v196_v3 = vld [vmem:[%s174_s6 + $0x24] sm:$0xf] }
  0x1a   : > { %195 = vst [vmem:[%s169_s7 + $0x8] sm:$0xf] %v194_v2  ;;  %v198_v4 = vld [vmem:[%s174_s6 + $0x30] sm:$0xf]  ;;  %v200_v5 = vld [vmem:[%s174_s6 + $0x3c] sm:$0xf] }
  0x1b   : > { %197 = vst [vmem:[%s169_s7 + $0xc] sm:$0xf] %v196_v3  ;;  %199 = vst [vmem:[%s169_s7 + $0x10] sm:$0xf] %v198_v4  ;;  %v202_v6 = vld [vmem:[%s174_s6 + $0x48] sm:$0xf] }
  0x1c   : > { %201 = vst [vmem:[%s169_s7 + $0x14] sm:$0xf] %v200_v5  ;;  %v204_v7 = vld [vmem:[%s174_s6 + $0x54] sm:$0xf]  ;;  %203 = vst [vmem:[%s169_s7 + $0x18] sm:$0xf] %v202_v6 }
  0x1d   : > { %205 = vst [vmem:[%s169_s7 + $0x1c] sm:$0xf] %v204_v7 }
  0x1e PF: > { %p735_p7 = scmp.ge.s32.totalorder %s973_s18, 1  ;;  %p255_p8 = scmp.lt.s32.totalorder %s973_s18, 7 }
  0x20   : > { %p256_p9 = pnand %p735_p7, %p255_p8 }
  0x21   : > { %s262_s8 = sand.u32 (!%p256_p9), 1, %s949_s12   ;;  %s737_s9 = sshll.u32 (!%p256_p9), %s957_s14, 4 }
  0x22   : > { %259 = sbr.rel (%p256_p9) target bundleno = 321 (0x141), region = 69  ;;  %s736_s10 = sshll.u32 (!%p256_p9), %s262_s8, 5 }
  0x23   : > { %p301_p10 = scmp.lt.s32.totalorder (!%p256_p9), %s737_s9, 47  ;;  %s739_s11 = sshll.u32 (!%p256_p9), %s961_s15, 3 }
  0x24   : > { %p313_p11 = scmp.lt.s32.totalorder (!%p256_p9), %s739_s11, 15  ;;  %s1071_s12 = scalar_lea.vmem (!%p256_p9), [#allocation3], %s736_s10 }
  0x25   : > { %p741_p12 = scmp.ne.s32.totalorder (!%p256_p9), %s957_s14, 0 }
  0x29   : > { %s1132_s9 = smov (!%p301_p10, %s737_s9), 47  ;;  %s1134_s11 = smov (!%p313_p11, %s739_s11), 15 }
  0x2a   : > { %s738_s21 = sshll.u32 %s1132_s9, 2  ;;  %s740_s26 = sshll.u32 %s1134_s11, 2  ;;  %v975_v8 = vmov (!%p741_p12), 0.0  }
  0x2b   : > { %s1064_s24 = scalar_lea.vmem %s1116_s1, %s738_s21  ;;  %s1069_s29 = scalar_lea.vmem %s1118_s3, %s740_s26  ;;  %326 = vst [vmem:[#allocation2] sm:$0xff] (!%p741_p12), %v975_v8  ;;  %327 = vst [vmem:[#allocation2 + $0x8] sm:$0xff] (!%p741_p12), %v975_v8 }
  0x2c   : > { %325 = sbr.rel (%p741_p12) target bundleno = 51 (0x33), region = 77  ;;  %328 = vst [vmem:[#allocation2 + $0x10] sm:$0xff] (!%p741_p12), %v975_v8  ;;  %329 = vst [vmem:[#allocation2 + $0x18] sm:$0xff] (!%p741_p12), %v975_v8 }
  0x2d   : > { %330 = vst [vmem:[#allocation2 + $0x20] sm:$0xff] (!%p741_p12), %v975_v8  ;;  %331 = vst [vmem:[#allocation2 + $0x28] sm:$0xff] (!%p741_p12), %v975_v8 }
  0x2e   : > { %332 = vst [vmem:[#allocation2 + $0x30] sm:$0xff] (!%p741_p12), %v975_v8  ;;  %333 = vst [vmem:[#allocation2 + $0x38] sm:$0xff] (!%p741_p12), %v975_v8 }
  0x33 PF: > { %v907_v9 = vld [vmem:[%s1064_s24] sm:$0xff]   ;;  %v908_v10 = vld [vmem:[%s1064_s24 + $0x8] sm:$0xff]   ;;  %v909_v11 = vld [vmem:[%s1064_s24 + $0x10] sm:$0xff]   ;;  %p754_p13 = scmp.ne.s32.totalorder %s957_s14, 2 }
  0x34   : > { %809 = vmatprep.subr.bf16.mxu0 %v907_v9  ;;  %833 = vmatprep.subr.bf16.mxu1 %v907_v9  ;;  %v910_v12 = vld [vmem:[%s1064_s24 + $0x18] sm:$0xff]   ;;  %v915_v13 = vld [vmem:[%s1071_s12] sm:$0xff]   ;;  %v916_v14 = vld [vmem:[%s1071_s12 + $0x10] sm:$0xff]  }
  0x35   : > { %810 = vmatpush3.bf16.msra.mxu0 %v907_v9  ;;  %841 = vmatpush3.bf16.msra.mxu1 %v907_v9  ;;  %v911_v15 = vld [vmem:[%s1064_s24 + $0x20] sm:$0xff]   ;;  %v912_v16 = vld [vmem:[%s1064_s24 + $0x28] sm:$0xff]   ;;  %v913_v17 = vld [vmem:[%s1064_s24 + $0x30] sm:$0xff]  }
  0x36   : > { %811 = vmatprep.subr.bf16.mxu0 %v908_v10  ;;  %834 = vmatprep.subr.bf16.mxu1 %v908_v10  ;;  %v914_v18 = vld [vmem:[%s1064_s24 + $0x38] sm:$0xff]   ;;  %v917_v19 = vld [vmem:[%s1071_s12 + $0x8] sm:$0xff]   ;;  %v336_v21 = vld [vmem:[#allocation2 + $0x10] sm:$0xff] }
  0x37   : > { %825 = vmatprep.mubr.bf16.mxu0 %v915_v13  ;;  %829 = vmatprep.mubr.bf16.mxu1 %v916_v14  ;;  %v918_v20 = vld [vmem:[%s1071_s12 + $0x18] sm:$0xff]   ;;  %v340_v22 = vld [vmem:[#allocation2 + $0x30] sm:$0xff]  ;;  %v334_v23 = vld [vmem:[#allocation2] sm:$0xff] }
  0x38   : > { %v338_v24 = vld [vmem:[#allocation2 + $0x20] sm:$0xff]  ;;  %v337_v27 = vld [vmem:[#allocation2 + $0x18] sm:$0xff]  ;;  %v335_v33 = vld [vmem:[#allocation2 + $0x8] sm:$0xff] }
  0x39   : > { %812 = vmatpush3.bf16.msra.mxu0 %v908_v10  ;;  %842 = vmatpush3.bf16.msra.mxu1 %v908_v10  ;;  %v341_v28 = vld [vmem:[#allocation2 + $0x38] sm:$0xff]  ;;  %v339_v34 = vld [vmem:[#allocation2 + $0x28] sm:$0xff]  ;;  %v755_v47 = vld [vmem:[%s1117_s2] ss:$0 sm:$0xff] (!%p754_p13) }
  0x3a   : > { %813 = vmatprep.subr.bf16.mxu0 %v909_v11  ;;  %835 = vmatprep.subr.bf16.mxu1 %v909_v11 }
  0x3d   : > { %814 = vmatpush3.bf16.msra.mxu0 %v909_v11  ;;  %843 = vmatpush3.bf16.msra.mxu1 %v909_v11 }
  0x3e   : > { %815 = vmatprep.subr.bf16.mxu0 %v910_v12  ;;  %836 = vmatprep.subr.bf16.mxu1 %v910_v12 }
  0x41   : > { %816 = vmatpush3.bf16.msra.mxu0 %v910_v12  ;;  %844 = vmatpush3.bf16.msra.mxu1 %v910_v12 }
  0x42   : > { %817 = vmatprep.subr.bf16.mxu0 %v911_v15  ;;  %837 = vmatprep.subr.bf16.mxu1 %v911_v15 }
  0x45   : > { %818 = vmatpush3.bf16.msra.mxu0 %v911_v15  ;;  %845 = vmatpush3.bf16.msra.mxu1 %v911_v15 }
  0x46   : > { %819 = vmatprep.subr.bf16.mxu0 %v912_v16  ;;  %838 = vmatprep.subr.bf16.mxu1 %v912_v16 }
  0x49   : > { %820 = vmatpush3.bf16.msra.mxu0 %v912_v16  ;;  %846 = vmatpush3.bf16.msra.mxu1 %v912_v16 }
  0x4a   : > { %821 = vmatprep.subr.bf16.mxu0 %v913_v17  ;;  %839 = vmatprep.subr.bf16.mxu1 %v913_v17 }
  0x4d   : > { %822 = vmatpush3.bf16.msra.mxu0 %v913_v17  ;;  %847 = vmatpush3.bf16.msra.mxu1 %v913_v17 }
  0x4e   : > { %823 = vmatprep.subr.bf16.mxu0 %v914_v18  ;;  %840 = vmatprep.subr.bf16.mxu1 %v914_v18 }
  0x51   : > { %824 = vmatpush3.bf16.msra.mxu0 %v914_v18  ;;  %848 = vmatpush3.bf16.msra.mxu1 %v914_v18 }
  0x54   : > { %826 = vmatmul.mubr.bf16.vlgmr.msra.gmra.mrb[0].mxu0 %v917_v19  ;;  %830 = vmatmul.mubr.bf16.vlgmr.msra.gmra.mrb[0].mxu1 %v918_v20 }
 0x127   : > { %v827_v25 = vpop.f32.mrb[0].mxu0  ;;  %v831_v26 = vpop.f32.mrb[0].mxu1  ;;  %522 = sbr.rel (%p754_p13) target bundleno = 321 (0x141), region = 81 }
 0x128   : > { %v505_v29 = vadd.f32 %v827_v25, %v336_v21  ;;  %v509_v30 = vadd.f32 %v831_v26, %v340_v22  ;;  %v472_v31 = vpop.f32.mrb[1].mxu0  ;;  %v488_v32 = vpop.f32.mrb[1].mxu1 }
 0x129   : > { %v503_v35 = vadd.f32 %v472_v31, %v334_v23  ;;  %v507_v36 = vadd.f32 %v488_v32, %v338_v24  ;;  %v828_v37 = vpop.f32.mrb[2].mxu0  ;;  %v832_v38 = vpop.f32.mrb[2].mxu1 }
 0x12a   : > { %513 = vst [vmem:[#allocation2 + $0x10] sm:$0xff] %v505_v29  ;;  %517 = vst [vmem:[#allocation2 + $0x30] sm:$0xff] %v509_v30  ;;  %v506_v39 = vadd.f32 %v828_v37, %v337_v27  ;;  %v510_v40 = vadd.f32 %v832_v38, %v341_v28  ;;  %v475_v41 = vpop.f32.mrb[3].mxu0  ;;  %v491_v42 = vpop.f32.mrb[3].mxu1 }
 0x12b   : > { %511 = vst [vmem:[#allocation2] sm:$0xff] %v503_v35  ;;  %515 = vst [vmem:[#allocation2 + $0x20] sm:$0xff] %v507_v36  ;;  %v504_v43 = vadd.f32 %v475_v41, %v335_v33  ;;  %v508_v44 = vadd.f32 %v491_v42, %v339_v34 }
 0x12c   : > { %514 = vst [vmem:[#allocation2 + $0x18] sm:$0xff] %v506_v39  ;;  %518 = vst [vmem:[#allocation2 + $0x38] sm:$0xff] %v510_v40 }
 0x12d   : > { %512 = vst [vmem:[#allocation2 + $0x8] sm:$0xff] %v504_v43  ;;  %516 = vst [vmem:[#allocation2 + $0x28] sm:$0xff] %v508_v44 }
 0x131   : > { %v525_v50 = vld [vmem:[#allocation2 + $0x10] sm:$0xff] }
 0x132   : > { %v523_v45 = vld [vmem:[#allocation2] sm:$0xff]  ;;  %v540_v53 = vadd.f32 %v755_v47, %v525_v50  ;;  %v529_v57 = vld [vmem:[#allocation2 + $0x30] sm:$0xff] }
 0x133   : > { %v538_v48 = vadd.f32 %v755_v47, %v523_v45  ;;  %v526_v51 = vld [vmem:[#allocation2 + $0x18] sm:$0xff]  ;;  %v527_v52 = vld [vmem:[#allocation2 + $0x20] sm:$0xff]  ;;  %v544_v8 = vadd.f32 %v755_v47, %v529_v57 }
 0x134   : > { %v524_v46 = vld [vmem:[#allocation2 + $0x8] sm:$0xff]  ;;  %v541_v54 = vadd.f32 %v755_v47, %v526_v51  ;;  %v542_v56 = vadd.f32 %v755_v47, %v527_v52  ;;  %vm548_vm2 = vcmp.ge.f32.partialorder %v540_v53, 0.0  ;;  %v556_v60 = vmul.f32 0.2, %v540_v53  ;;  %v530_v1 = vld [vmem:[#allocation2 + $0x38] sm:$0xff] }
 0x135   : > { %v539_v49 = vadd.f32 %v755_v47, %v524_v46  ;;  %v528_v55 = vld [vmem:[#allocation2 + $0x28] sm:$0xff]  ;;  %vm546_vm0 = vcmp.ge.f32.partialorder %v538_v48, 0.0  ;;  %v554_v58 = vmul.f32 0.2, %v538_v48  ;;  %v545_v10 = vadd.f32 %v755_v47, %v530_v1 }
 0x136   : > { %vm549_vm3 = vcmp.ge.f32.partialorder %v541_v54, 0.0  ;;  %v557_v61 = vmul.f32 0.2, %v541_v54  ;;  %v543_v0 = vadd.f32 %v755_v47, %v528_v55  ;;  %vm550_vm4 = vcmp.ge.f32.partialorder %v542_v56, 0.0 }
 0x137   : > { %vm547_vm1 = vcmp.ge.f32.partialorder %v539_v49, 0.0  ;;  %v555_v59 = vmul.f32 0.2, %v539_v49  ;;  %v562_v62 = vsel %vm546_vm0, %v538_v48, %v554_v58  ;;  %v564_v3 = vsel %vm548_vm2, %v540_v53, %v556_v60 }
 0x138   : > { %v565_v4 = vsel %vm549_vm3, %v541_v54, %v557_v61  ;;  %v558_v5 = vmul.f32 0.2, %v542_v56  ;;  %vm551_vm5 = vcmp.ge.f32.partialorder %v543_v0, 0.0  ;;  %v559_v7 = vmul.f32 0.2, %v543_v0 }
 0x139   : > { %v563_v63 = vsel %vm547_vm1, %v539_v49, %v555_v59  ;;  %v782_v6 = vpack.c.bf16 %v565_v4, %v564_v3  ;;  %vm552_vm6 = vcmp.ge.f32.partialorder %v544_v8, 0.0  ;;  %v560_v12 = vmul.f32 0.2, %v544_v8 }
 0x13a   : > { %v777_v2 = vpack.c.bf16 %v563_v63, %v562_v62  ;;  %v566_v9 = vsel %vm550_vm4, %v542_v56, %v558_v5  ;;  %v567_v11 = vsel %vm551_vm5, %v543_v0, %v559_v7  ;;  %vm553_vm7 = vcmp.ge.f32.partialorder %v545_v10, 0.0 }
 0x13b   : > { %794 = vst [vmem:[%s1069_s29 + $0x8] sm:$0xff] %v782_v6   ;;  %v787_v13 = vpack.c.bf16 %v567_v11, %v566_v9  ;;  %v561_v14 = vmul.f32 0.2, %v545_v10  ;;  %v568_v15 = vsel %vm552_vm6, %v544_v8, %v560_v12 }
 0x13c   : > { %778 = vst [vmem:[%s1069_s29] sm:$0xff] %v777_v2  }
 0x13d   : > { %795 = vst [vmem:[%s1069_s29 + $0x10] sm:$0xff] %v787_v13   ;;  %v569_v16 = vsel %vm553_vm7, %v545_v10, %v561_v14 }
 0x13e   : > { %v792_v17 = vpack.c.bf16 %v569_v16, %v568_v15 }
 0x140   : > { %796 = vst [vmem:[%s1069_s29 + $0x18] sm:$0xff] %v792_v17  }
 0x141 PF: > { %s13_s18 = sadd.s32 1, %s973_s18   ;;  %s1119_s12 = smov %s953_s13 }
 0x142   : > { %p10_p0 = scmp.ge.s32.totalorder %s13_s18, 8   ;;  %s1120_s13 = smov %s1047_s25 }
 0x143   : > { %s1121_s14 = smov %s965_s16  ;;  %s1122_s15 = smov %s969_s17 }
 0x144   : > { %s1123_s16 = smov %s1126_s19  ;;  %s1124_s17 = smov %s1130_s20 }
 0x145   :  { %12 = sbr.rel (!%p10_p0) target bundleno = 4 (0x4), region = 122 }

// kernel: discriminator_forward.9
= control target key start
LH: loop header
LB: loop body
LE: loop exit
PB: predicated region body
PF: predicated region fallthrough
CT: control target
= control target key end

     0   :  { %s869_s0 = inlined_call_operand.vmem [shape: bf16[112,640], index: 0, kind: input, shape index: {}]   ;;  %s870_s1 = inlined_call_operand.vmem [shape: bf16[1,640], index: 1, kind: input, shape index: {}]   ;;  %s871_s2 = inlined_call_operand.<no memory space> [shape: f32[1,1], index: 2, kind: input, shape index: {}]   ;;  %s872_s3 = inlined_call_operand.vmem [shape: f32[112,1], index: 3, kind: output, shape index: {}]  }
   0x1   :  { %v8_v0 = vstv %s871_s2 }
   0x2   :  { %9 = vst [vmem:[#allocation3] sm:$0x1] %v8_v0 }
   0x3   :  { %s722_s14 = smov 0   ;;  %s724_s15 = smov 0  }
   0x4   :  { %s726_s16 = smov 0   ;;  %s728_s17 = smov 0  }
   0x5   :  { %s730_s18 = smov 0  }
   0x6 LB: > { %s24_s2 = sadd.s32 1, %s692_s17  ;;  %p43_p1 = scmp.ne.s32.totalorder %s684_s15, %s680_s14  ;;  %s696_s18 = sphi %s730_s18, %s15_s18   ;;  %s692_s17 = sphi %s728_s17, %s876_s17   ;;  %s688_s16 = sphi %s726_s16, %s875_s16   ;;  %s684_s15 = sphi %s724_s15, %s874_s15   ;;  %s680_s14 = sphi %s722_s14, %s873_s14  }
   0x7   : > { %p25_p0 = scmp.ge.s32.totalorder %s24_s2, 5  ;;  %p44_p2 = scmp.eq.s32.totalorder %s696_s18, 0 }
   0x8   : > { %s36_s20 = sadd.s32 1, %s684_s15  ;;  %p571_p5 = scmp.ge.s32.totalorder %s696_s18, 5 }
   0x9   : > { %s878_s2 = smov (%p25_p0, %s24_s2), 0  ;;  %p45_p3 = por %p44_p2, %p43_p1 }
   0xa   : > { %s32_s19 = ssub.s32 %s692_s17, %s878_s2  ;;  %145 = sbr.rel (%p571_p5) target bundleno = 30 (0x1e), region = 20 }
   0xb   : > { %p34_p4 = scmp.eq.s32.totalorder %s32_s19, 0 }
   0xd   : > { %s757_s21 = scalar_select %p34_p4, %s684_s15, %s36_s20  }
  0x11   : > { %148 = sbr.rel (!%p45_p3) target bundleno = 30 (0x1e), region = 24  ;;  %s150_s22 = sand.u32 (%p45_p3), 1, %s684_s15  }
  0x12   : > { %s572_s23 = sshll.u32 (%p45_p3), %s692_s17, 2  ;;  %s615_s24 = smul.u32 (%p45_p3), 56, %s150_s22 }
  0x13   : > { %s157_s27 = scalar_lea.vmem (%p45_p3), %s869_s0, %s572_s23 }
  0x14   : > { %v173_v1 = vld [vmem:[%s157_s27] sm:$0xf] (%p45_p3)  ;;  %v175_v2 = vld [vmem:[%s157_s27 + $0x14] sm:$0xf] (%p45_p3)  ;;  %v177_v3 = vld [vmem:[%s157_s27 + $0x28] sm:$0xf] (%p45_p3) }
  0x15   : > { %v179_v4 = vld [vmem:[%s157_s27 + $0x3c] sm:$0xf] (%p45_p3)  ;;  %v181_v5 = vld [vmem:[%s157_s27 + $0x50] sm:$0xf] (%p45_p3)  ;;  %s152_s28 = scalar_lea.vmem (%p45_p3), [#allocation4], %s615_s24 }
  0x16   : > { %174 = vst [vmem:[%s152_s28] sm:$0xf] (%p45_p3), %v173_v1  ;;  %176 = vst [vmem:[%s152_s28 + $0x4] sm:$0xf] (%p45_p3), %v175_v2  ;;  %v183_v6 = vld [vmem:[%s157_s27 + $0x64] sm:$0xf] (%p45_p3) }
  0x17   : > { %178 = vst [vmem:[%s152_s28 + $0x8] sm:$0xf] (%p45_p3), %v177_v3  ;;  %180 = vst [vmem:[%s152_s28 + $0xc] sm:$0xf] (%p45_p3), %v179_v4  ;;  %v185_v7 = vld [vmem:[%s157_s27 + $0x78] sm:$0xf] (%p45_p3) }
  0x18   : > { %182 = vst [vmem:[%s152_s28 + $0x10] sm:$0xf] %v181_v5  ;;  %v187_v8 = vld [vmem:[%s157_s27 + $0x8c] sm:$0xf]  ;;  %184 = vst [vmem:[%s152_s28 + $0x14] sm:$0xf] %v183_v6 }
  0x19   : > { %186 = vst [vmem:[%s152_s28 + $0x18] sm:$0xf] %v185_v7  ;;  %188 = vst [vmem:[%s152_s28 + $0x1c] sm:$0xf] %v187_v8  ;;  %v189_v9 = vld [vmem:[%s157_s27 + $0xa0] sm:$0xf] }
  0x1a   : > { %v191_v10 = vld [vmem:[%s157_s27 + $0xb4] sm:$0xf]  ;;  %v193_v11 = vld [vmem:[%s157_s27 + $0xc8] sm:$0xf]  ;;  %190 = vst [vmem:[%s152_s28 + $0x20] sm:$0xf] %v189_v9 }
  0x1b   : > { %192 = vst [vmem:[%s152_s28 + $0x24] sm:$0xf] %v191_v10  ;;  %194 = vst [vmem:[%s152_s28 + $0x28] sm:$0xf] %v193_v11  ;;  %v195_v12 = vld [vmem:[%s157_s27 + $0xdc] sm:$0xf] }
  0x1c   : > { %v197_v13 = vld [vmem:[%s157_s27 + $0xf0] sm:$0xf]  ;;  %v199_v14 = vld [vmem:[%s157_s27 + $0x104] sm:$0xf]  ;;  %196 = vst [vmem:[%s152_s28 + $0x2c] sm:$0xf] %v195_v12 }
  0x1d   : > { %198 = vst [vmem:[%s152_s28 + $0x30] sm:$0xf] %v197_v13  ;;  %200 = vst [vmem:[%s152_s28 + $0x34] sm:$0xf] %v199_v14 }
  0x1e PF: > { %p573_p6 = scmp.ge.s32.totalorder %s696_s18, 1  ;;  %p256_p7 = scmp.lt.s32.totalorder %s696_s18, 6 }
  0x20   : > { %p257_p8 = pnand %p573_p6, %p256_p7 }
  0x21   : > { %s263_s29 = sand.u32 (!%p257_p8), 1, %s680_s14   ;;  %p290_p9 = scmp.lt.s32.totalorder (!%p257_p8), %s688_s16, 4 }
  0x22   : > { %260 = sbr.rel (%p257_p8) target bundleno = 239 (0xef), region = 69  ;;  %p574_p10 = scmp.ne.s32.totalorder (!%p257_p8), %s688_s16, 0 }
  0x23   : > { %s616_s30 = smul.u32 (!%p257_p8), 56, %s263_s29 }
  0x25   : > { %s773_s8 = scalar_lea.vmem (!%p257_p8), [#allocation4], %s616_s30 }
  0x29   : > { %s291_s4 = scalar_select %p290_p9, %s688_s16, 4 }
  0x2a   : > { %302 = sbr.rel (%p574_p10) target bundleno = 50 (0x32), region = 77  ;;  %vm303_vm0 = vcmask (!%p574_p10), 7168   ;;  %v698_v15 = vmov (!%p574_p10), 0.0  }
  0x2b   : > { %s292_s7 = scalar_lea.vmem %s870_s1, %s291_s4  ;;  %304 = vst.msk [vmem:[#allocation2] sm:$0xff] (!%p574_p10), %vm303_vm0, %v698_v15  ;;  %305 = vst.msk [vmem:[#allocation2 + $0x8] sm:$0xff] (!%p574_p10), %vm303_vm0, %v698_v15 }
  0x2c   : > { %306 = vst.msk [vmem:[#allocation2 + $0x10] sm:$0xff] (!%p574_p10), %vm303_vm0, %v698_v15  ;;  %307 = vst.msk [vmem:[#allocation2 + $0x18] sm:$0xff] (!%p574_p10), %vm303_vm0, %v698_v15 }
  0x2d   : > { %308 = vst.msk [vmem:[#allocation2 + $0x20] sm:$0xff] (!%p574_p10), %vm303_vm0, %v698_v15  ;;  %309 = vst.msk [vmem:[#allocation2 + $0x28] sm:$0xff] (!%p574_p10), %vm303_vm0, %v698_v15 }
  0x2e   : > { %310 = vst.msk [vmem:[#allocation2 + $0x30] sm:$0xff] (!%p574_p10), %vm303_vm0, %v698_v15  ;;  %311 = vst.msk [vmem:[#allocation2 + $0x38] sm:$0xff] (!%p574_p10), %vm303_vm0, %v698_v15 }
  0x2f   : > { %312 = vst.msk [vmem:[#allocation2 + $0x40] sm:$0xff] (!%p574_p10), %vm303_vm0, %v698_v15  ;;  %313 = vst.msk [vmem:[#allocation2 + $0x48] sm:$0xff] (!%p574_p10), %vm303_vm0, %v698_v15 }
  0x30   : > { %314 = vst.msk [vmem:[#allocation2 + $0x50] sm:$0xff] (!%p574_p10), %vm303_vm0, %v698_v15  ;;  %315 = vst.msk [vmem:[#allocation2 + $0x58] sm:$0xff] (!%p574_p10), %vm303_vm0, %v698_v15 }
  0x31   : > { %316 = vst.msk [vmem:[#allocation2 + $0x60] sm:$0xff] %vm303_vm0, %v698_v15  ;;  %317 = vst.msk [vmem:[#allocation2 + $0x68] sm:$0xff] %vm303_vm0, %v698_v15 }
  0x32 PF: > { %v346_v16 = vld [vmem:[%s292_s7] sm:$0x1]  ;;  %v348_v17 = vlaneseq  ;;  %v582_v19 = vld [vmem:[%s773_s8] sm:$0xff]   ;;  %v611_v35 = vld [vmem:[%s773_s8 + $0x18] sm:$0xff]   ;;  %vm422_vm1 = vcmask 7168   ;;  %p575_p11 = scmp.ne.s32.totalorder %s688_s16, 4 }
  0x33   : > { %v609_v18 = vld [vmem:[%s773_s8 + $0x8] sm:$0xff]   ;;  %v347_v20 = vunpack.c.l.bf16 %v346_v16  ;;  %v583_v24 = vunpack.c.l.bf16 %v582_v19  ;;  %v584_v27 = vunpack.c.h.bf16 %v582_v19  ;;  %v610_v28 = vld [vmem:[%s773_s8 + $0x10] sm:$0xff]   ;;  %v596_v38 = vunpack.c.h.bf16 %v611_v35  ;;  %v612_v40 = vld [vmem:[%s773_s8 + $0x20] sm:$0xff]  }
  0x34   : > { %v349_v21 = vshrl.u32 %v348_v17, 7  ;;  %v587_v22 = vunpack.c.l.bf16 %v609_v18  ;;  %v588_v26 = vunpack.c.h.bf16 %v609_v18  ;;  %v592_v33 = vunpack.c.h.bf16 %v610_v28  ;;  %v613_v45 = vld [vmem:[%s773_s8 + $0x28] sm:$0xff]   ;;  %v614_v50 = vld [vmem:[%s773_s8 + $0x30] sm:$0xff]  }
  0x35   : > { %v591_v34 = vunpack.c.l.bf16 %v610_v28  ;;  %v595_v39 = vunpack.c.l.bf16 %v611_v35  ;;  %v600_v43 = vunpack.c.h.bf16 %v612_v40  ;;  %v599_v44 = vunpack.c.l.bf16 %v612_v40  ;;  %v368_v57 = vld [vmem:[#allocation2 + $0x10] sm:$0xff]  ;;  %v366_v58 = vld [vmem:[#allocation2] sm:$0xff]  ;;  %v369_v63 = vld [vmem:[#allocation2 + $0x18] sm:$0xff] }
  0x36   : > { %v350_v23 = vsub.s32 0, %v349_v21  ;;  %v604_v48 = vunpack.c.h.bf16 %v613_v45  ;;  %v603_v49 = vunpack.c.l.bf16 %v613_v45  ;;  %v608_v53 = vunpack.c.h.bf16 %v614_v50  ;;  %v367_v0 = vld [vmem:[#allocation2 + $0x8] sm:$0xff]  ;;  %v370_v6 = vld [vmem:[#allocation2 + $0x20] sm:$0xff]  ;;  %v373_v11 = vld [vmem:[#allocation2 + $0x38] sm:$0xff] }
  0x37   : > { %v607_v54 = vunpack.c.l.bf16 %v614_v50  ;;  %v371_v5 = vld [vmem:[#allocation2 + $0x28] sm:$0xff]  ;;  %v372_v12 = vld [vmem:[#allocation2 + $0x30] sm:$0xff]  ;;  %v374_v18 = vld [vmem:[#allocation2 + $0x40] sm:$0xff] }
  0x38   : > { %v351_v25 = vrot.slane %v347_v20, %v350_v23  ;;  %v375_v17 = vld [vmem:[#allocation2 + $0x48] sm:$0xff]  ;;  %v377_v23 = vld [vmem:[#allocation2 + $0x58] sm:$0xff] }
  0x3a   : > { %v354_v29 = vmul.f32 %v587_v22, %v351_v25  ;;  %v352_v30 = vmul.f32 %v583_v24, %v351_v25  ;;  %v355_v31 = vmul.f32 %v588_v26, %v351_v25  ;;  %v353_v32 = vmul.f32 %v584_v27, %v351_v25  ;;  %v376_v24 = vld [vmem:[#allocation2 + $0x50] sm:$0xff] }
  0x3b   : > { %v357_v36 = vmul.f32 %v592_v33, %v351_v25  ;;  %v356_v37 = vmul.f32 %v591_v34, %v351_v25  ;;  %v359_v41 = vmul.f32 %v596_v38, %v351_v25  ;;  %v358_v42 = vmul.f32 %v595_v39, %v351_v25 }
  0x3c   : > { %384 = vadd.xlane.f32.xlu1 %v354_v29  ;;  %380 = vadd.xlane.f32.xlu0 %v352_v30  ;;  %v361_v46 = vmul.f32 %v600_v43, %v351_v25  ;;  %v360_v47 = vmul.f32 %v599_v44, %v351_v25  ;;  %v363_v51 = vmul.f32 %v604_v48, %v351_v25  ;;  %v379_v29 = vld [vmem:[#allocation2 + $0x68] sm:$0xff]  ;;  %v378_v30 = vld [vmem:[#allocation2 + $0x60] sm:$0xff] }
  0x3d   : > { %v362_v52 = vmul.f32 %v603_v49, %v351_v25  ;;  %v365_v55 = vmul.f32 %v608_v53, %v351_v25  ;;  %v364_v56 = vmul.f32 %v607_v54, %v351_v25 }
  0x40   : > { %386 = vadd.xlane.f32.xlu1 %v355_v31  ;;  %382 = vadd.xlane.f32.xlu0 %v353_v32 }
  0x44   : > { %390 = vadd.xlane.f32.xlu1 %v357_v36  ;;  %388 = vadd.xlane.f32.xlu0 %v356_v37  ;;  %v576_v36 = vld [vmem:[#allocation3] ss:$0 sm:$0xff] (!%p575_p11) }
  0x48   : > { %394 = vadd.xlane.f32.xlu1 %v359_v41  ;;  %392 = vadd.xlane.f32.xlu0 %v358_v42 }
  0x4c   : > { %398 = vadd.xlane.f32.xlu1 %v361_v46  ;;  %396 = vadd.xlane.f32.xlu0 %v360_v47 }
  0x50   : > { %402 = vadd.xlane.f32.xlu1 %v363_v51  ;;  %400 = vadd.xlane.f32.xlu0 %v362_v52 }
  0x54   : > { %406 = vadd.xlane.f32.xlu1 %v365_v55  ;;  %404 = vadd.xlane.f32.xlu0 %v364_v56 }
  0xc9   : > { %v385_v59 = vpop.xlane.xlu1 %384  ;;  %v381_v60 = vpop.xlane.xlu0 %380 }
  0xca   : > { %v410_v61 = vadd.f32 %v385_v59, %v368_v57  ;;  %v408_v62 = vadd.f32 %v381_v60, %v366_v58 }
  0xcc   : > { %425 = vst.msk [vmem:[#allocation2 + $0x10] sm:$0xff] %vm422_vm1, %v410_v61  ;;  %423 = vst.msk [vmem:[#allocation2] sm:$0xff] %vm422_vm1, %v408_v62 }
  0xcd   : > { %v387_v1 = vpop.xlane.xlu1 %386  ;;  %v383_v2 = vpop.xlane.xlu0 %382 }
  0xce   : > { %v411_v3 = vadd.f32 %v387_v1, %v369_v63  ;;  %v409_v4 = vadd.f32 %v383_v2, %v367_v0 }
  0xd0   : > { %426 = vst.msk [vmem:[#allocation2 + $0x18] sm:$0xff] %vm422_vm1, %v411_v3  ;;  %424 = vst.msk [vmem:[#allocation2 + $0x8] sm:$0xff] %vm422_vm1, %v409_v4 }
  0xd1   : > { %v391_v7 = vpop.xlane.xlu1 %390  ;;  %v389_v8 = vpop.xlane.xlu0 %388 }
  0xd2   : > { %v413_v9 = vadd.f32 %v391_v7, %v371_v5  ;;  %v412_v10 = vadd.f32 %v389_v8, %v370_v6 }
  0xd3   : > { %v441_v35 = vld [vmem:[#allocation2] sm:$0xff] (!%p575_p11)  ;;  %v443_v40 = vld [vmem:[#allocation2 + $0x10] sm:$0xff] (!%p575_p11) }
  0xd4   : > { %428 = vst.msk [vmem:[#allocation2 + $0x28] sm:$0xff] %vm422_vm1, %v413_v9  ;;  %427 = vst.msk [vmem:[#allocation2 + $0x20] sm:$0xff] %vm422_vm1, %v412_v10  ;;  %v462_v38 = vadd.f32 (!%p575_p11), %v576_v36, %v441_v35  ;;  %v464_v43 = vadd.f32 (!%p575_p11), %v576_v36, %v443_v40 }
  0xd5   : > { %v395_v13 = vpop.xlane.xlu1 %394  ;;  %v393_v14 = vpop.xlane.xlu0 %392 }
  0xd6   : > { %v415_v15 = vadd.f32 %v395_v13, %v373_v11  ;;  %v414_v16 = vadd.f32 %v393_v14, %v372_v12  ;;  %476 = vst.msk [vmem:[%s872_s3] sm:$0xff] (!%p575_p11), %vm422_vm1, %v462_v38  ;;  %478 = vst.msk [vmem:[%s872_s3 + $0x10] sm:$0xff] (!%p575_p11), %vm422_vm1, %v464_v43 }
  0xd7   : > { %v442_v37 = vld [vmem:[#allocation2 + $0x8] sm:$0xff] (!%p575_p11)  ;;  %v444_v41 = vld [vmem:[#allocation2 + $0x18] sm:$0xff] (!%p575_p11) }
  0xd8   : > { %430 = vst.msk [vmem:[#allocation2 + $0x38] sm:$0xff] %vm422_vm1, %v415_v15  ;;  %429 = vst.msk [vmem:[#allocation2 + $0x30] sm:$0xff] %vm422_vm1, %v414_v16  ;;  %v463_v39 = vadd.f32 (!%p575_p11), %v576_v36, %v442_v37  ;;  %v465_v44 = vadd.f32 (!%p575_p11), %v576_v36, %v444_v41 }
  0xd9   : > { %v399_v19 = vpop.xlane.xlu1 %398  ;;  %v397_v20 = vpop.xlane.xlu0 %396 }
  0xda   : > { %v417_v21 = vadd.f32 %v399_v19, %v375_v17  ;;  %v416_v22 = vadd.f32 %v397_v20, %v374_v18  ;;  %477 = vst.msk [vmem:[%s872_s3 + $0x8] sm:$0xff] (!%p575_p11), %vm422_vm1, %v463_v39  ;;  %479 = vst.msk [vmem:[%s872_s3 + $0x18] sm:$0xff] (!%p575_p11), %vm422_vm1, %v465_v44 }
  0xdb   : > { %v445_v42 = vld [vmem:[#allocation2 + $0x20] sm:$0xff] (!%p575_p11)  ;;  %v446_v46 = vld [vmem:[#allocation2 + $0x28] sm:$0xff] (!%p575_p11) }
  0xdc   : > { %432 = vst.msk [vmem:[#allocation2 + $0x48] sm:$0xff] %vm422_vm1, %v417_v21  ;;  %431 = vst.msk [vmem:[#allocation2 + $0x40] sm:$0xff] %vm422_vm1, %v416_v22  ;;  %v466_v45 = vadd.f32 (!%p575_p11), %v576_v36, %v445_v42  ;;  %v467_v49 = vadd.f32 (!%p575_p11), %v576_v36, %v446_v46 }
  0xdd   : > { %v403_v25 = vpop.xlane.xlu1 %402  ;;  %v401_v26 = vpop.xlane.xlu0 %400 }
  0xde   : > { %v419_v27 = vadd.f32 %v403_v25, %v377_v23  ;;  %v418_v28 = vadd.f32 %v401_v26, %v376_v24  ;;  %440 = sbr.rel (%p575_p11) target bundleno = 239 (0xef), region = 81  ;;  %480 = vst.msk [vmem:[%s872_s3 + $0x20] sm:$0xff] (!%p575_p11), %vm422_vm1, %v466_v45  ;;  %481 = vst.msk [vmem:[%s872_s3 + $0x28] sm:$0xff] (!%p575_p11), %vm422_vm1, %v467_v49 }
  0xdf   : > { %v447_v47 = vld [vmem:[#allocation2 + $0x30] sm:$0xff] (!%p575_p11)  ;;  %v448_v48 = vld [vmem:[#allocation2 + $0x38] sm:$0xff] (!%p575_p11) }
  0xe0   : > { %434 = vst.msk [vmem:[#allocation2 + $0x58] sm:$0xff] %vm422_vm1, %v419_v27  ;;  %433 = vst.msk [vmem:[#allocation2 + $0x50] sm:$0xff] %vm422_vm1, %v418_v28  ;;  %v468_v50 = vadd.f32 (!%p575_p11), %v576_v36, %v447_v47  ;;  %v469_v51 = vadd.f32 (!%p575_p11), %v576_v36, %v448_v48 }
  0xe1   : > { %v407_v31 = vpop.xlane.xlu1 %406  ;;  %v405_v32 = vpop.xlane.xlu0 %404 }
  0xe2   : > { %v421_v33 = vadd.f32 %v407_v31, %v379_v29  ;;  %v420_v34 = vadd.f32 %v405_v32, %v378_v30  ;;  %482 = vst.msk [vmem:[%s872_s3 + $0x30] sm:$0xff] (!%p575_p11), %vm422_vm1, %v468_v50  ;;  %483 = vst.msk [vmem:[%s872_s3 + $0x38] sm:$0xff] (!%p575_p11), %vm422_vm1, %v469_v51 }
  0xe3   : > { %v449_v52 = vld [vmem:[#allocation2 + $0x40] sm:$0xff] (!%p575_p11)  ;;  %v450_v53 = vld [vmem:[#allocation2 + $0x48] sm:$0xff] (!%p575_p11) }
  0xe4   : > { %436 = vst.msk [vmem:[#allocation2 + $0x68] sm:$0xff] %vm422_vm1, %v421_v33  ;;  %435 = vst.msk [vmem:[#allocation2 + $0x60] sm:$0xff] %vm422_vm1, %v420_v34  ;;  %v470_v55 = vadd.f32 (!%p575_p11), %v576_v36, %v449_v52  ;;  %v471_v56 = vadd.f32 (!%p575_p11), %v576_v36, %v450_v53 }
  0xe6   : > { %484 = vst.msk [vmem:[%s872_s3 + $0x40] sm:$0xff] %vm422_vm1, %v470_v55  ;;  %485 = vst.msk [vmem:[%s872_s3 + $0x48] sm:$0xff] %vm422_vm1, %v471_v56 }
  0xe7   : > { %v451_v54 = vld [vmem:[#allocation2 + $0x50] sm:$0xff]  ;;  %v452_v58 = vld [vmem:[#allocation2 + $0x58] sm:$0xff] }
  0xe8   : > { %v472_v57 = vadd.f32 %v576_v36, %v451_v54  ;;  %v473_v61 = vadd.f32 %v576_v36, %v452_v58 }
  0xea   : > { %486 = vst.msk [vmem:[%s872_s3 + $0x50] sm:$0xff] %vm422_vm1, %v472_v57  ;;  %487 = vst.msk [vmem:[%s872_s3 + $0x58] sm:$0xff] %vm422_vm1, %v473_v61 }
  0xeb   : > { %v453_v59 = vld [vmem:[#allocation2 + $0x60] sm:$0xff]  ;;  %v454_v60 = vld [vmem:[#allocation2 + $0x68] sm:$0xff] }
  0xec   : > { %v474_v62 = vadd.f32 %v576_v36, %v453_v59  ;;  %v475_v63 = vadd.f32 %v576_v36, %v454_v60 }
  0xee   : > { %488 = vst.msk [vmem:[%s872_s3 + $0x60] sm:$0xff] %vm422_vm1, %v474_v62  ;;  %489 = vst.msk [vmem:[%s872_s3 + $0x68] sm:$0xff] %vm422_vm1, %v475_v63 }
  0xef PF: > { %s15_s18 = sadd.s32 1, %s696_s18   ;;  %s873_s14 = smov %s684_s15 }
  0xf0   : > { %p12_p12 = scmp.ge.s32.totalorder %s15_s18, 7   ;;  %s874_s15 = smov %s757_s21 }
  0xf1   : > { %s875_s16 = smov %s692_s17  ;;  %s876_s17 = smov %s878_s2 }
  0xf2   :  { %14 = sbr.rel (!%p12_p12) target bundleno = 6 (0x6), region = 119 }

</bundles_post_ra>
